<compile_context>
chip_gen: v5e
topology: v5e:2x2
jax: 0.10.0
libtpu: 0.0.40
codegen_flags: <defaults>
</compile_context>

<pallas_src>
import jax
import jax.numpy as jnp
from jax import lax
from jax.experimental import pallas as pl
from jax.experimental.pallas import tpu as pltpu


LANE = 128


def _round_up(x, m):
    return (x + m - 1) // m * m


def _rnn_kernel(x_ref,       # (T, TB, INp)   f32  time-major input tile
                wih0_ref,    # (INp, Hp)      bf16 layer-0 input weight (transposed)
                wihr_ref,    # (Lr, Hp, Hp)   bf16 layer>=1 input weights (transposed)
                whh_ref,     # (L, Hp, Hp)    bf16 hidden weights (transposed)
                b_ref,       # (L, Hp)        f32  b_ih + b_hh (pre-added, zero-padded)
                fcw_ref,     # (Hp, Sp)       bf16 fc weight (transposed)
                fcb_ref,     # (1, Sp)        f32
                out_ref,     # (TB, Sp)       f32
                z_buf,       # VMEM (T*TB, Hp) f32: current-layer pre-activations
                seq_buf):    # VMEM (T*TB, Hp) f32: previous-layer hidden sequence
    T, TB, INp = x_ref.shape
    L = whh_ref.shape[0]
    Hp = whh_ref.shape[-1]
    f32 = jnp.float32
    bf16 = jnp.bfloat16

    def run_layer(whh, keep_seq):
        # Serial recurrence over the pre-computed input projections in z_buf.
        # Only h @ W_hh + add + tanh sits on the per-timestep critical path.
        def step(t, h):
            row = pl.multiple_of(t * TB, TB)
            z = z_buf[pl.ds(row, TB), :]                       # (TB, Hp) f32
            h_new = jnp.tanh(
                z + jnp.dot(h.astype(bf16), whh,
                            preferred_element_type=f32))
            if keep_seq:                                       # skip dead stores on last layer
                seq_buf[pl.ds(row, TB), :] = h_new             # unmasked (8,128) store
            return h_new
        return lax.fori_loop(0, T, step, jnp.zeros((TB, Hp), f32),
                             unroll=True)

    # ---- layer 0: hoisted, batched input projection for all timesteps ----
    x_flat = x_ref[...].reshape(T * TB, INp).astype(bf16)
    z_buf[...] = (jnp.dot(x_flat, wih0_ref[...], preferred_element_type=f32)
                  + b_ref[pl.ds(0, 1), :])
    h = run_layer(whh_ref[0], keep_seq=(L > 1))

    # ---- layers 1 .. L-1: batched projection of previous layer's sequence ----
    for l in range(1, L):
        z_buf[...] = (jnp.dot(seq_buf[...].astype(bf16), wihr_ref[l - 1],
                              preferred_element_type=f32)
                      + b_ref[pl.ds(l, 1), :])
        h = run_layer(whh_ref[l], keep_seq=(l < L - 1))

    # ---- fc + relu on h_n[-1] ----
    out = (jnp.dot(h.astype(bf16), fcw_ref[...], preferred_element_type=f32)
           + fcb_ref[...])
    out_ref[...] = jnp.maximum(out, 0.0)


def recurrent_net_forward(x, params, *, batch_tile=8):
    """x: (B, T, in_size) float32 (PyTorch batch_first layout)."""
    (w_ih0, w_ih_rest, w_hh, b_ih, b_hh, fc_w, fc_b) = params
    B, T, in_size = x.shape
    n_layers, H, _ = w_hh.shape
    S = fc_w.shape[0]

    INp = _round_up(in_size, LANE)
    Hp = _round_up(H, LANE)
    Sp = _round_up(S, LANE)
    TB = batch_tile
    Bp = _round_up(B, TB)

    f32 = jnp.float32
    bf16 = jnp.bfloat16

    # time-major, batch/lane zero-padded input (kept f32 so the in-kernel
    # (T, TB, INp) -> (T*TB, INp) reshape is layout-trivial)
    x_tm = jnp.transpose(x.astype(f32), (1, 0, 2))                      # (T, B, in)
    x_tm = jnp.pad(x_tm, ((0, 0), (0, Bp - B), (0, INp - in_size)))

    # pre-transposed, zero-padded, bf16 weights; pre-added f32 biases
    wih0 = jnp.pad(jnp.transpose(w_ih0).astype(f32),
                   ((0, INp - in_size), (0, Hp - H))).astype(bf16)      # (INp, Hp)
    wihr = jnp.pad(jnp.transpose(w_ih_rest, (0, 2, 1)).astype(f32),
                   ((0, 0), (0, Hp - H), (0, Hp - H))).astype(bf16)     # (Lr, Hp, Hp)
    whh = jnp.pad(jnp.transpose(w_hh, (0, 2, 1)).astype(f32),
                  ((0, 0), (0, Hp - H), (0, Hp - H))).astype(bf16)      # (L, Hp, Hp)
    bias = jnp.pad((b_ih + b_hh).astype(f32), ((0, 0), (0, Hp - H)))    # (L, Hp)
    fcw = jnp.pad(jnp.transpose(fc_w).astype(f32),
                  ((0, Hp - H), (0, Sp - S))).astype(bf16)              # (Hp, Sp)
    fcb = jnp.pad(fc_b.astype(f32), (0, Sp - S)).reshape(1, Sp)         # (1, Sp)

    L = n_layers
    Lr = wihr.shape[0]

    out = pl.pallas_call(
        _rnn_kernel,
        out_shape=jax.ShapeDtypeStruct((Bp, Sp), f32),
        grid=(Bp // TB,),
        in_specs=[
            pl.BlockSpec((T, TB, INp), lambda i: (0, i, 0)),
            pl.BlockSpec((INp, Hp), lambda i: (0, 0)),
            pl.BlockSpec((Lr, Hp, Hp), lambda i: (0, 0, 0)),
            pl.BlockSpec((L, Hp, Hp), lambda i: (0, 0, 0)),
            pl.BlockSpec((L, Hp), lambda i: (0, 0)),
            pl.BlockSpec((Hp, Sp), lambda i: (0, 0)),
            pl.BlockSpec((1, Sp), lambda i: (0, 0)),
        ],
        out_specs=pl.BlockSpec((TB, Sp), lambda i: (i, 0)),
        scratch_shapes=[pltpu.VMEM((T * TB, Hp), f32),   # z_buf
                        pltpu.VMEM((T * TB, Hp), f32)],  # seq_buf
        compiler_params=pltpu.CompilerParams(
            dimension_semantics=("parallel",)),
    )(x_tm, wih0, wihr, whh, bias, fcw, fcb)
    return out[:B, :S]


def recurrent_net_reference(x, params):
    """Pure-JAX f32 reference matching nn.RNN(batch_first=True) + fc + relu."""
    (w_ih0, w_ih_rest, w_hh, b_ih, b_hh, fc_w, fc_b) = params
    B, T, _ = x.shape
    L, H, _ = w_hh.shape
    seq = x.astype(jnp.float32)
    for l in range(L):
        w_ih = w_ih0 if l == 0 else w_ih_rest[l - 1]
        h = jnp.zeros((B, H), jnp.float32)
        outs = []
        for t in range(T):
            h = jnp.tanh(seq[:, t] @ w_ih.T + h @ w_hh[l].T + b_ih[l] + b_hh[l])
            outs.append(h)
        seq = jnp.stack(outs, axis=1)
    return jax.nn.relu(seq[:, -1] @ fc_w.T + fc_b)


def init_params(key, in_size, hid_size, n_layers, seq_length):
    """Deterministic init mirroring nn.RNN / nn.Linear parameter shapes."""
    k = 1.0 / jnp.sqrt(hid_size)
    keys = jax.random.split(key, 7)
    w_ih0 = jax.random.uniform(keys[0], (hid_size, in_size), jnp.float32, -k, k)
    n_rest = max(n_layers - 1, 1)
    w_ih_rest = jax.random.uniform(keys[1], (n_rest, hid_size, hid_size),
                                   jnp.float32, -k, k)
    w_hh = jax.random.uniform(keys[2], (n_layers, hid_size, hid_size),
                              jnp.float32, -k, k)
    b_ih = jax.random.uniform(keys[3], (n_layers, hid_size), jnp.float32, -k, k)
    b_hh = jax.random.uniform(keys[4], (n_layers, hid_size), jnp.float32, -k, k)
    fc_w = jax.random.uniform(keys[5], (seq_length, hid_size), jnp.float32, -k, k)
    fc_b = jax.random.uniform(keys[6], (seq_length,), jnp.float32, -k, k)
    return (w_ih0, w_ih_rest, w_hh, b_ih, b_hh, fc_w, fc_b)


if __name__ == "__main__":
    # small shapes consistent with the module's forward
    batch_size = 32
    seq_len = 8        # time dimension (also the fc output width, as in the module)
    in_size = 8
    hid_size = 15
    n_layers = 3

    key = jax.random.PRNGKey(0)
    kx, kp = jax.random.split(key)
    x = jax.random.normal(kx, (batch_size, seq_len, in_size), jnp.float32)
    params = init_params(kp, in_size, hid_size, n_layers, seq_length=seq_len)

    out = recurrent_net_forward(x, params)
    out = jax.block_until_ready(out)
    assert out.shape == (batch_size, seq_len)
    assert bool(jnp.all(out >= 0.0))  # relu output

    # correctness vs. pure-JAX f32 reference (loose tol: bf16 matmul operands)
    ref = recurrent_net_reference(x, params)
    max_err = float(jnp.max(jnp.abs(out - ref)))
    assert max_err < 1e-1, f"max abs err {max_err}"

    print("KERNEL_OK")
</pallas_src>

<mosaic_0001>
module attributes {stable_mosaic.version = 11 : i64} {
  func.func @_rnn_kernel(%arg0: i32, %arg1: memref<8x8x128xf32, #tpu.memory_space<vmem>>, %arg2: memref<128x128xbf16, #tpu.memory_space<vmem>>, %arg3: memref<2x128x128xbf16, #tpu.memory_space<vmem>>, %arg4: memref<3x128x128xbf16, #tpu.memory_space<vmem>>, %arg5: memref<3x128xf32, #tpu.memory_space<vmem>>, %arg6: memref<128x128xbf16, #tpu.memory_space<vmem>>, %arg7: memref<1x128xf32, #tpu.memory_space<vmem>>, %arg8: memref<8x128xf32, #tpu.memory_space<vmem>>, %arg9: memref<64x128xf32, #tpu.memory_space<vmem>>, %arg10: memref<64x128xf32, #tpu.memory_space<vmem>>) attributes {dimension_semantics = [#tpu.dimension_semantics<parallel>], iteration_bounds = array<i64: 4>, scalar_prefetch = 0 : i64, scratch_operands = 2 : i64, tpu.core_type = #tpu.core_type<tc>, window_params = [{transform_indices = @transform_0, window_bounds = array<i64: 8, 8, 128>}, {pipeline_mode = #tpu.pipeline_mode<synchronous>, transform_indices = @transform_1, window_bounds = array<i64: 128, 128>}, {pipeline_mode = #tpu.pipeline_mode<synchronous>, transform_indices = @transform_2, window_bounds = array<i64: 2, 128, 128>}, {pipeline_mode = #tpu.pipeline_mode<synchronous>, transform_indices = @transform_3, window_bounds = array<i64: 3, 128, 128>}, {pipeline_mode = #tpu.pipeline_mode<synchronous>, transform_indices = @transform_4, window_bounds = array<i64: 3, 128>}, {pipeline_mode = #tpu.pipeline_mode<synchronous>, transform_indices = @transform_5, window_bounds = array<i64: 128, 128>}, {pipeline_mode = #tpu.pipeline_mode<synchronous>, transform_indices = @transform_6, window_bounds = array<i64: 1, 128>}, {transform_indices = @transform_7, window_bounds = array<i64: 8, 128>}]} {
    %c0 = arith.constant 0 : index
    %c0_0 = arith.constant 0 : index
    %c0_1 = arith.constant 0 : index
    %0 = vector.load %arg1[%c0, %c0_0, %c0_1] : memref<8x8x128xf32, #tpu.memory_space<vmem>>, vector<8x8x128xf32>
    %1 = vector.shape_cast %0 : vector<8x8x128xf32> to vector<64x128xf32>
    %2 = arith.truncf %1 : vector<64x128xf32> to vector<64x128xbf16>
    %c0_2 = arith.constant 0 : index
    %c0_3 = arith.constant 0 : index
    %3 = vector.load %arg2[%c0_2, %c0_3] : memref<128x128xbf16, #tpu.memory_space<vmem>>, vector<128x128xbf16>
    %cst = arith.constant dense<0.000000e+00> : vector<64x128xf32>
    %4 = tpu.matmul %2, %3, %cst {dimension_numbers = #tpu.dot_dimension_numbers<[1], [0], [0], [1], [0, 0, 1, 1], [], []>} : vector<64x128xbf16>, vector<128x128xbf16>, vector<64x128xf32> -> vector<64x128xf32>
    %c0_4 = arith.constant 0 : index
    %c0_5 = arith.constant 0 : index
    %5 = vector.load %arg5[%c0_4, %c0_5] : memref<3x128xf32, #tpu.memory_space<vmem>>, vector<1x128xf32>
    %6 = vector.broadcast %5 : vector<1x128xf32> to vector<64x128xf32>
    %7 = arith.addf %4, %6 : vector<64x128xf32>
    %c0_6 = arith.constant 0 : index
    %c0_7 = arith.constant 0 : index
    %8 = vector.load %arg9[%c0_6, %c0_7] : memref<64x128xf32, #tpu.memory_space<vmem>>, vector<64x128xf32>
    tpu.vector_store %arg9[%c0_6, %c0_7], %7 {strides = array<i32>} : memref<64x128xf32, #tpu.memory_space<vmem>>, vector<64x128xf32>,
    %c0_8 = arith.constant 0 : index
    %c0_9 = arith.constant 0 : index
    %c0_10 = arith.constant 0 : index
    %9 = vector.load %arg4[%c0_8, %c0_9, %c0_10] : memref<3x128x128xbf16, #tpu.memory_space<vmem>>, vector<1x128x128xbf16>
    %10 = vector.shape_cast %9 : vector<1x128x128xbf16> to vector<128x128xbf16>
    %cst_11 = arith.constant 0.000000e+00 : f32
    %11 = vector.broadcast %cst_11 : f32 to vector<8x128xf32>
    %c0_i32 = arith.constant 0 : i32
    %c8_i32 = arith.constant 8 : i32
    %12 = arith.muli %c0_i32, %c8_i32 : i32
    %13 = tpu.assume_multiple %12, 8 : i32
    %14 = arith.index_cast %13 : i32 to index
    %c0_12 = arith.constant 0 : index
    %15 = vector.load %arg9[%14, %c0_12] : memref<64x128xf32, #tpu.memory_space<vmem>>, vector<8x128xf32>
    %16 = arith.truncf %11 : vector<8x128xf32> to vector<8x128xbf16>
    %cst_13 = arith.constant dense<0.000000e+00> : vector<8x128xf32>
    %17 = tpu.matmul %16, %10, %cst_13 {dimension_numbers = #tpu.dot_dimension_numbers<[1], [0], [0], [1], [0, 0, 1, 1], [], []>} : vector<8x128xbf16>, vector<128x128xbf16>, vector<8x128xf32> -> vector<8x128xf32>
    %18 = arith.addf %15, %17 : vector<8x128xf32>
    %19 = math.tanh %18 : vector<8x128xf32>
    %20 = arith.index_cast %13 : i32 to index
    %c0_14 = arith.constant 0 : index
    %21 = vector.load %arg10[%20, %c0_14] : memref<64x128xf32, #tpu.memory_space<vmem>>, vector<8x128xf32>
    tpu.vector_store %arg10[%20, %c0_14], %19 {strides = array<i32>} : memref<64x128xf32, #tpu.memory_space<vmem>>, vector<8x128xf32>,
    %c1_i32 = arith.constant 1 : i32
    %c8_i32_15 = arith.constant 8 : i32
    %22 = arith.muli %c1_i32, %c8_i32_15 : i32
    %23 = tpu.assume_multiple %22, 8 : i32
    %24 = arith.index_cast %23 : i32 to index
    %c0_16 = arith.constant 0 : index
    %25 = vector.load %arg9[%24, %c0_16] : memref<64x128xf32, #tpu.memory_space<vmem>>, vector<8x128xf32>
    %26 = arith.truncf %19 : vector<8x128xf32> to vector<8x128xbf16>
    %cst_17 = arith.constant dense<0.000000e+00> : vector<8x128xf32>
    %27 = tpu.matmul %26, %10, %cst_17 {dimension_numbers = #tpu.dot_dimension_numbers<[1], [0], [0], [1], [0, 0, 1, 1], [], []>} : vector<8x128xbf16>, vector<128x128xbf16>, vector<8x128xf32> -> vector<8x128xf32>
    %28 = arith.addf %25, %27 : vector<8x128xf32>
    %29 = math.tanh %28 : vector<8x128xf32>
    %30 = arith.index_cast %23 : i32 to index
    %c0_18 = arith.constant 0 : index
    %31 = vector.load %arg10[%30, %c0_18] : memref<64x128xf32, #tpu.memory_space<vmem>>, vector<8x128xf32>
    tpu.vector_store %arg10[%30, %c0_18], %29 {strides = array<i32>} : memref<64x128xf32, #tpu.memory_space<vmem>>, vector<8x128xf32>,
    %c2_i32 = arith.constant 2 : i32
    %c8_i32_19 = arith.constant 8 : i32
    %32 = arith.muli %c2_i32, %c8_i32_19 : i32
    %33 = tpu.assume_multiple %32, 8 : i32
    %34 = arith.index_cast %33 : i32 to index
    %c0_20 = arith.constant 0 : index
    %35 = vector.load %arg9[%34, %c0_20] : memref<64x128xf32, #tpu.memory_space<vmem>>, vector<8x128xf32>
    %36 = arith.truncf %29 : vector<8x128xf32> to vector<8x128xbf16>
    %cst_21 = arith.constant dense<0.000000e+00> : vector<8x128xf32>
    %37 = tpu.matmul %36, %10, %cst_21 {dimension_numbers = #tpu.dot_dimension_numbers<[1], [0], [0], [1], [0, 0, 1, 1], [], []>} : vector<8x128xbf16>, vector<128x128xbf16>, vector<8x128xf32> -> vector<8x128xf32>
    %38 = arith.addf %35, %37 : vector<8x128xf32>
    %39 = math.tanh %38 : vector<8x128xf32>
    %40 = arith.index_cast %33 : i32 to index
    %c0_22 = arith.constant 0 : index
    %41 = vector.load %arg10[%40, %c0_22] : memref<64x128xf32, #tpu.memory_space<vmem>>, vector<8x128xf32>
    tpu.vector_store %arg10[%40, %c0_22], %39 {strides = array<i32>} : memref<64x128xf32, #tpu.memory_space<vmem>>, vector<8x128xf32>,
    %c3_i32 = arith.constant 3 : i32
    %c8_i32_23 = arith.constant 8 : i32
    %42 = arith.muli %c3_i32, %c8_i32_23 : i32
    %43 = tpu.assume_multiple %42, 8 : i32
    %44 = arith.index_cast %43 : i32 to index
    %c0_24 = arith.constant 0 : index
    %45 = vector.load %arg9[%44, %c0_24] : memref<64x128xf32, #tpu.memory_space<vmem>>, vector<8x128xf32>
    %46 = arith.truncf %39 : vector<8x128xf32> to vector<8x128xbf16>
    %cst_25 = arith.constant dense<0.000000e+00> : vector<8x128xf32>
    %47 = tpu.matmul %46, %10, %cst_25 {dimension_numbers = #tpu.dot_dimension_numbers<[1], [0], [0], [1], [0, 0, 1, 1], [], []>} : vector<8x128xbf16>, vector<128x128xbf16>, vector<8x128xf32> -> vector<8x128xf32>
    %48 = arith.addf %45, %47 : vector<8x128xf32>
    %49 = math.tanh %48 : vector<8x128xf32>
    %50 = arith.index_cast %43 : i32 to index
    %c0_26 = arith.constant 0 : index
    %51 = vector.load %arg10[%50, %c0_26] : memref<64x128xf32, #tpu.memory_space<vmem>>, vector<8x128xf32>
    tpu.vector_store %arg10[%50, %c0_26], %49 {strides = array<i32>} : memref<64x128xf32, #tpu.memory_space<vmem>>, vector<8x128xf32>,
    %c4_i32 = arith.constant 4 : i32
    %c8_i32_27 = arith.constant 8 : i32
    %52 = arith.muli %c4_i32, %c8_i32_27 : i32
    %53 = tpu.assume_multiple %52, 8 : i32
    %54 = arith.index_cast %53 : i32 to index
    %c0_28 = arith.constant 0 : index
    %55 = vector.load %arg9[%54, %c0_28] : memref<64x128xf32, #tpu.memory_space<vmem>>, vector<8x128xf32>
    %56 = arith.truncf %49 : vector<8x128xf32> to vector<8x128xbf16>
    %cst_29 = arith.constant dense<0.000000e+00> : vector<8x128xf32>
    %57 = tpu.matmul %56, %10, %cst_29 {dimension_numbers = #tpu.dot_dimension_numbers<[1], [0], [0], [1], [0, 0, 1, 1], [], []>} : vector<8x128xbf16>, vector<128x128xbf16>, vector<8x128xf32> -> vector<8x128xf32>
    %58 = arith.addf %55, %57 : vector<8x128xf32>
    %59 = math.tanh %58 : vector<8x128xf32>
    %60 = arith.index_cast %53 : i32 to index
    %c0_30 = arith.constant 0 : index
    %61 = vector.load %arg10[%60, %c0_30] : memref<64x128xf32, #tpu.memory_space<vmem>>, vector<8x128xf32>
    tpu.vector_store %arg10[%60, %c0_30], %59 {strides = array<i32>} : memref<64x128xf32, #tpu.memory_space<vmem>>, vector<8x128xf32>,
    %c5_i32 = arith.constant 5 : i32
    %c8_i32_31 = arith.constant 8 : i32
    %62 = arith.muli %c5_i32, %c8_i32_31 : i32
    %63 = tpu.assume_multiple %62, 8 : i32
    %64 = arith.index_cast %63 : i32 to index
    %c0_32 = arith.constant 0 : index
    %65 = vector.load %arg9[%64, %c0_32] : memref<64x128xf32, #tpu.memory_space<vmem>>, vector<8x128xf32>
    %66 = arith.truncf %59 : vector<8x128xf32> to vector<8x128xbf16>
    %cst_33 = arith.constant dense<0.000000e+00> : vector<8x128xf32>
    %67 = tpu.matmul %66, %10, %cst_33 {dimension_numbers = #tpu.dot_dimension_numbers<[1], [0], [0], [1], [0, 0, 1, 1], [], []>} : vector<8x128xbf16>, vector<128x128xbf16>, vector<8x128xf32> -> vector<8x128xf32>
    %68 = arith.addf %65, %67 : vector<8x128xf32>
    %69 = math.tanh %68 : vector<8x128xf32>
    %70 = arith.index_cast %63 : i32 to index
    %c0_34 = arith.constant 0 : index
    %71 = vector.load %arg10[%70, %c0_34] : memref<64x128xf32, #tpu.memory_space<vmem>>, vector<8x128xf32>
    tpu.vector_store %arg10[%70, %c0_34], %69 {strides = array<i32>} : memref<64x128xf32, #tpu.memory_space<vmem>>, vector<8x128xf32>,
    %c6_i32 = arith.constant 6 : i32
    %c8_i32_35 = arith.constant 8 : i32
    %72 = arith.muli %c6_i32, %c8_i32_35 : i32
    %73 = tpu.assume_multiple %72, 8 : i32
    %74 = arith.index_cast %73 : i32 to index
    %c0_36 = arith.constant 0 : index
    %75 = vector.load %arg9[%74, %c0_36] : memref<64x128xf32, #tpu.memory_space<vmem>>, vector<8x128xf32>
    %76 = arith.truncf %69 : vector<8x128xf32> to vector<8x128xbf16>
    %cst_37 = arith.constant dense<0.000000e+00> : vector<8x128xf32>
    %77 = tpu.matmul %76, %10, %cst_37 {dimension_numbers = #tpu.dot_dimension_numbers<[1], [0], [0], [1], [0, 0, 1, 1], [], []>} : vector<8x128xbf16>, vector<128x128xbf16>, vector<8x128xf32> -> vector<8x128xf32>
    %78 = arith.addf %75, %77 : vector<8x128xf32>
    %79 = math.tanh %78 : vector<8x128xf32>
    %80 = arith.index_cast %73 : i32 to index
    %c0_38 = arith.constant 0 : index
    %81 = vector.load %arg10[%80, %c0_38] : memref<64x128xf32, #tpu.memory_space<vmem>>, vector<8x128xf32>
    tpu.vector_store %arg10[%80, %c0_38], %79 {strides = array<i32>} : memref<64x128xf32, #tpu.memory_space<vmem>>, vector<8x128xf32>,
    %c7_i32 = arith.constant 7 : i32
    %c8_i32_39 = arith.constant 8 : i32
    %82 = arith.muli %c7_i32, %c8_i32_39 : i32
    %83 = tpu.assume_multiple %82, 8 : i32
    %84 = arith.index_cast %83 : i32 to index
    %c0_40 = arith.constant 0 : index
    %85 = vector.load %arg9[%84, %c0_40] : memref<64x128xf32, #tpu.memory_space<vmem>>, vector<8x128xf32>
    %86 = arith.truncf %79 : vector<8x128xf32> to vector<8x128xbf16>
    %cst_41 = arith.constant dense<0.000000e+00> : vector<8x128xf32>
    %87 = tpu.matmul %86, %10, %cst_41 {dimension_numbers = #tpu.dot_dimension_numbers<[1], [0], [0], [1], [0, 0, 1, 1], [], []>} : vector<8x128xbf16>, vector<128x128xbf16>, vector<8x128xf32> -> vector<8x128xf32>
    %88 = arith.addf %85, %87 : vector<8x128xf32>
    %89 = math.tanh %88 : vector<8x128xf32>
    %90 = arith.index_cast %83 : i32 to index
    %c0_42 = arith.constant 0 : index
    %91 = vector.load %arg10[%90, %c0_42] : memref<64x128xf32, #tpu.memory_space<vmem>>, vector<8x128xf32>
    tpu.vector_store %arg10[%90, %c0_42], %89 {strides = array<i32>} : memref<64x128xf32, #tpu.memory_space<vmem>>, vector<8x128xf32>,
    %c8_i32_43 = arith.constant 8 : i32
    %c0_44 = arith.constant 0 : index
    %c0_45 = arith.constant 0 : index
    %92 = vector.load %arg10[%c0_44, %c0_45] : memref<64x128xf32, #tpu.memory_space<vmem>>, vector<64x128xf32>
    %93 = arith.truncf %92 : vector<64x128xf32> to vector<64x128xbf16>
    %c0_46 = arith.constant 0 : index
    %c0_47 = arith.constant 0 : index
    %c0_48 = arith.constant 0 : index
    %94 = vector.load %arg3[%c0_46, %c0_47, %c0_48] : memref<2x128x128xbf16, #tpu.memory_space<vmem>>, vector<1x128x128xbf16>
    %95 = vector.shape_cast %94 : vector<1x128x128xbf16> to vector<128x128xbf16>
    %cst_49 = arith.constant dense<0.000000e+00> : vector<64x128xf32>
    %96 = tpu.matmul %93, %95, %cst_49 {dimension_numbers = #tpu.dot_dimension_numbers<[1], [0], [0], [1], [0, 0, 1, 1], [], []>} : vector<64x128xbf16>, vector<128x128xbf16>, vector<64x128xf32> -> vector<64x128xf32>
    %c1 = arith.constant 1 : index
    %c0_50 = arith.constant 0 : index
    %97 = vector.load %arg5[%c1, %c0_50] : memref<3x128xf32, #tpu.memory_space<vmem>>, vector<1x128xf32>
    %98 = vector.broadcast %97 : vector<1x128xf32> to vector<64x128xf32>
    %99 = arith.addf %96, %98 : vector<64x128xf32>
    %c0_51 = arith.constant 0 : index
    %c0_52 = arith.constant 0 : index
    %100 = vector.load %arg9[%c0_51, %c0_52] : memref<64x128xf32, #tpu.memory_space<vmem>>, vector<64x128xf32>
    tpu.vector_store %arg9[%c0_51, %c0_52], %99 {strides = array<i32>} : memref<64x128xf32, #tpu.memory_space<vmem>>, vector<64x128xf32>,
    %c1_53 = arith.constant 1 : index
    %c0_54 = arith.constant 0 : index
    %c0_55 = arith.constant 0 : index
    %101 = vector.load %arg4[%c1_53, %c0_54, %c0_55] : memref<3x128x128xbf16, #tpu.memory_space<vmem>>, vector<1x128x128xbf16>
    %102 = vector.shape_cast %101 : vector<1x128x128xbf16> to vector<128x128xbf16>
    %cst_56 = arith.constant 0.000000e+00 : f32
    %103 = vector.broadcast %cst_56 : f32 to vector<8x128xf32>
    %c0_i32_57 = arith.constant 0 : i32
    %c8_i32_58 = arith.constant 8 : i32
    %104 = arith.muli %c0_i32_57, %c8_i32_58 : i32
    %105 = tpu.assume_multiple %104, 8 : i32
    %106 = arith.index_cast %105 : i32 to index
    %c0_59 = arith.constant 0 : index
    %107 = vector.load %arg9[%106, %c0_59] : memref<64x128xf32, #tpu.memory_space<vmem>>, vector<8x128xf32>
    %108 = arith.truncf %103 : vector<8x128xf32> to vector<8x128xbf16>
    %cst_60 = arith.constant dense<0.000000e+00> : vector<8x128xf32>
    %109 = tpu.matmul %108, %102, %cst_60 {dimension_numbers = #tpu.dot_dimension_numbers<[1], [0], [0], [1], [0, 0, 1, 1], [], []>} : vector<8x128xbf16>, vector<128x128xbf16>, vector<8x128xf32> -> vector<8x128xf32>
    %110 = arith.addf %107, %109 : vector<8x128xf32>
    %111 = math.tanh %110 : vector<8x128xf32>
    %112 = arith.index_cast %105 : i32 to index
    %c0_61 = arith.constant 0 : index
    %113 = vector.load %arg10[%112, %c0_61] : memref<64x128xf32, #tpu.memory_space<vmem>>, vector<8x128xf32>
    tpu.vector_store %arg10[%112, %c0_61], %111 {strides = array<i32>} : memref<64x128xf32, #tpu.memory_space<vmem>>, vector<8x128xf32>,
    %c1_i32_62 = arith.constant 1 : i32
    %c8_i32_63 = arith.constant 8 : i32
    %114 = arith.muli %c1_i32_62, %c8_i32_63 : i32
    %115 = tpu.assume_multiple %114, 8 : i32
    %116 = arith.index_cast %115 : i32 to index
    %c0_64 = arith.constant 0 : index
    %117 = vector.load %arg9[%116, %c0_64] : memref<64x128xf32, #tpu.memory_space<vmem>>, vector<8x128xf32>
    %118 = arith.truncf %111 : vector<8x128xf32> to vector<8x128xbf16>
    %cst_65 = arith.constant dense<0.000000e+00> : vector<8x128xf32>
    %119 = tpu.matmul %118, %102, %cst_65 {dimension_numbers = #tpu.dot_dimension_numbers<[1], [0], [0], [1], [0, 0, 1, 1], [], []>} : vector<8x128xbf16>, vector<128x128xbf16>, vector<8x128xf32> -> vector<8x128xf32>
    %120 = arith.addf %117, %119 : vector<8x128xf32>
    %121 = math.tanh %120 : vector<8x128xf32>
    %122 = arith.index_cast %115 : i32 to index
    %c0_66 = arith.constant 0 : index
    %123 = vector.load %arg10[%122, %c0_66] : memref<64x128xf32, #tpu.memory_space<vmem>>, vector<8x128xf32>
    tpu.vector_store %arg10[%122, %c0_66], %121 {strides = array<i32>} : memref<64x128xf32, #tpu.memory_space<vmem>>, vector<8x128xf32>,
    %c2_i32_67 = arith.constant 2 : i32
    %c8_i32_68 = arith.constant 8 : i32
    %124 = arith.muli %c2_i32_67, %c8_i32_68 : i32
    %125 = tpu.assume_multiple %124, 8 : i32
    %126 = arith.index_cast %125 : i32 to index
    %c0_69 = arith.constant 0 : index
    %127 = vector.load %arg9[%126, %c0_69] : memref<64x128xf32, #tpu.memory_space<vmem>>, vector<8x128xf32>
    %128 = arith.truncf %121 : vector<8x128xf32> to vector<8x128xbf16>
    %cst_70 = arith.constant dense<0.000000e+00> : vector<8x128xf32>
    %129 = tpu.matmul %128, %102, %cst_70 {dimension_numbers = #tpu.dot_dimension_numbers<[1], [0], [0], [1], [0, 0, 1, 1], [], []>} : vector<8x128xbf16>, vector<128x128xbf16>, vector<8x128xf32> -> vector<8x128xf32>
    %130 = arith.addf %127, %129 : vector<8x128xf32>
    %131 = math.tanh %130 : vector<8x128xf32>
    %132 = arith.index_cast %125 : i32 to index
    %c0_71 = arith.constant 0 : index
    %133 = vector.load %arg10[%132, %c0_71] : memref<64x128xf32, #tpu.memory_space<vmem>>, vector<8x128xf32>
    tpu.vector_store %arg10[%132, %c0_71], %131 {strides = array<i32>} : memref<64x128xf32, #tpu.memory_space<vmem>>, vector<8x128xf32>,
    %c3_i32_72 = arith.constant 3 : i32
    %c8_i32_73 = arith.constant 8 : i32
    %134 = arith.muli %c3_i32_72, %c8_i32_73 : i32
    %135 = tpu.assume_multiple %134, 8 : i32
    %136 = arith.index_cast %135 : i32 to index
    %c0_74 = arith.constant 0 : index
    %137 = vector.load %arg9[%136, %c0_74] : memref<64x128xf32, #tpu.memory_space<vmem>>, vector<8x128xf32>
    %138 = arith.truncf %131 : vector<8x128xf32> to vector<8x128xbf16>
    %cst_75 = arith.constant dense<0.000000e+00> : vector<8x128xf32>
    %139 = tpu.matmul %138, %102, %cst_75 {dimension_numbers = #tpu.dot_dimension_numbers<[1], [0], [0], [1], [0, 0, 1, 1], [], []>} : vector<8x128xbf16>, vector<128x128xbf16>, vector<8x128xf32> -> vector<8x128xf32>
    %140 = arith.addf %137, %139 : vector<8x128xf32>
    %141 = math.tanh %140 : vector<8x128xf32>
    %142 = arith.index_cast %135 : i32 to index
    %c0_76 = arith.constant 0 : index
    %143 = vector.load %arg10[%142, %c0_76] : memref<64x128xf32, #tpu.memory_space<vmem>>, vector<8x128xf32>
    tpu.vector_store %arg10[%142, %c0_76], %141 {strides = array<i32>} : memref<64x128xf32, #tpu.memory_space<vmem>>, vector<8x128xf32>,
    %c4_i32_77 = arith.constant 4 : i32
    %c8_i32_78 = arith.constant 8 : i32
    %144 = arith.muli %c4_i32_77, %c8_i32_78 : i32
    %145 = tpu.assume_multiple %144, 8 : i32
    %146 = arith.index_cast %145 : i32 to index
    %c0_79 = arith.constant 0 : index
    %147 = vector.load %arg9[%146, %c0_79] : memref<64x128xf32, #tpu.memory_space<vmem>>, vector<8x128xf32>
    %148 = arith.truncf %141 : vector<8x128xf32> to vector<8x128xbf16>
    %cst_80 = arith.constant dense<0.000000e+00> : vector<8x128xf32>
    %149 = tpu.matmul %148, %102, %cst_80 {dimension_numbers = #tpu.dot_dimension_numbers<[1], [0], [0], [1], [0, 0, 1, 1], [], []>} : vector<8x128xbf16>, vector<128x128xbf16>, vector<8x128xf32> -> vector<8x128xf32>
    %150 = arith.addf %147, %149 : vector<8x128xf32>
    %151 = math.tanh %150 : vector<8x128xf32>
    %152 = arith.index_cast %145 : i32 to index
    %c0_81 = arith.constant 0 : index
    %153 = vector.load %arg10[%152, %c0_81] : memref<64x128xf32, #tpu.memory_space<vmem>>, vector<8x128xf32>
    tpu.vector_store %arg10[%152, %c0_81], %151 {strides = array<i32>} : memref<64x128xf32, #tpu.memory_space<vmem>>, vector<8x128xf32>,
    %c5_i32_82 = arith.constant 5 : i32
    %c8_i32_83 = arith.constant 8 : i32
    %154 = arith.muli %c5_i32_82, %c8_i32_83 : i32
    %155 = tpu.assume_multiple %154, 8 : i32
    %156 = arith.index_cast %155 : i32 to index
    %c0_84 = arith.constant 0 : index
    %157 = vector.load %arg9[%156, %c0_84] : memref<64x128xf32, #tpu.memory_space<vmem>>, vector<8x128xf32>
    %158 = arith.truncf %151 : vector<8x128xf32> to vector<8x128xbf16>
    %cst_85 = arith.constant dense<0.000000e+00> : vector<8x128xf32>
    %159 = tpu.matmul %158, %102, %cst_85 {dimension_numbers = #tpu.dot_dimension_numbers<[1], [0], [0], [1], [0, 0, 1, 1], [], []>} : vector<8x128xbf16>, vector<128x128xbf16>, vector<8x128xf32> -> vector<8x128xf32>
    %160 = arith.addf %157, %159 : vector<8x128xf32>
    %161 = math.tanh %160 : vector<8x128xf32>
    %162 = arith.index_cast %155 : i32 to index
    %c0_86 = arith.constant 0 : index
    %163 = vector.load %arg10[%162, %c0_86] : memref<64x128xf32, #tpu.memory_space<vmem>>, vector<8x128xf32>
    tpu.vector_store %arg10[%162, %c0_86], %161 {strides = array<i32>} : memref<64x128xf32, #tpu.memory_space<vmem>>, vector<8x128xf32>,
    %c6_i32_87 = arith.constant 6 : i32
    %c8_i32_88 = arith.constant 8 : i32
    %164 = arith.muli %c6_i32_87, %c8_i32_88 : i32
    %165 = tpu.assume_multiple %164, 8 : i32
    %166 = arith.index_cast %165 : i32 to index
    %c0_89 = arith.constant 0 : index
    %167 = vector.load %arg9[%166, %c0_89] : memref<64x128xf32, #tpu.memory_space<vmem>>, vector<8x128xf32>
    %168 = arith.truncf %161 : vector<8x128xf32> to vector<8x128xbf16>
    %cst_90 = arith.constant dense<0.000000e+00> : vector<8x128xf32>
    %169 = tpu.matmul %168, %102, %cst_90 {dimension_numbers = #tpu.dot_dimension_numbers<[1], [0], [0], [1], [0, 0, 1, 1], [], []>} : vector<8x128xbf16>, vector<128x128xbf16>, vector<8x128xf32> -> vector<8x128xf32>
    %170 = arith.addf %167, %169 : vector<8x128xf32>
    %171 = math.tanh %170 : vector<8x128xf32>
    %172 = arith.index_cast %165 : i32 to index
    %c0_91 = arith.constant 0 : index
    %173 = vector.load %arg10[%172, %c0_91] : memref<64x128xf32, #tpu.memory_space<vmem>>, vector<8x128xf32>
    tpu.vector_store %arg10[%172, %c0_91], %171 {strides = array<i32>} : memref<64x128xf32, #tpu.memory_space<vmem>>, vector<8x128xf32>,
    %c7_i32_92 = arith.constant 7 : i32
    %c8_i32_93 = arith.constant 8 : i32
    %174 = arith.muli %c7_i32_92, %c8_i32_93 : i32
    %175 = tpu.assume_multiple %174, 8 : i32
    %176 = arith.index_cast %175 : i32 to index
    %c0_94 = arith.constant 0 : index
    %177 = vector.load %arg9[%176, %c0_94] : memref<64x128xf32, #tpu.memory_space<vmem>>, vector<8x128xf32>
    %178 = arith.truncf %171 : vector<8x128xf32> to vector<8x128xbf16>
    %cst_95 = arith.constant dense<0.000000e+00> : vector<8x128xf32>
    %179 = tpu.matmul %178, %102, %cst_95 {dimension_numbers = #tpu.dot_dimension_numbers<[1], [0], [0], [1], [0, 0, 1, 1], [], []>} : vector<8x128xbf16>, vector<128x128xbf16>, vector<8x128xf32> -> vector<8x128xf32>
    %180 = arith.addf %177, %179 : vector<8x128xf32>
    %181 = math.tanh %180 : vector<8x128xf32>
    %182 = arith.index_cast %175 : i32 to index
    %c0_96 = arith.constant 0 : index
    %183 = vector.load %arg10[%182, %c0_96] : memref<64x128xf32, #tpu.memory_space<vmem>>, vector<8x128xf32>
    tpu.vector_store %arg10[%182, %c0_96], %181 {strides = array<i32>} : memref<64x128xf32, #tpu.memory_space<vmem>>, vector<8x128xf32>,
    %c8_i32_97 = arith.constant 8 : i32
    %c0_98 = arith.constant 0 : index
    %c0_99 = arith.constant 0 : index
    %184 = vector.load %arg10[%c0_98, %c0_99] : memref<64x128xf32, #tpu.memory_space<vmem>>, vector<64x128xf32>
    %185 = arith.truncf %184 : vector<64x128xf32> to vector<64x128xbf16>
    %c1_100 = arith.constant 1 : index
    %c0_101 = arith.constant 0 : index
    %c0_102 = arith.constant 0 : index
    %186 = vector.load %arg3[%c1_100, %c0_101, %c0_102] : memref<2x128x128xbf16, #tpu.memory_space<vmem>>, vector<1x128x128xbf16>
    %187 = vector.shape_cast %186 : vector<1x128x128xbf16> to vector<128x128xbf16>
    %cst_103 = arith.constant dense<0.000000e+00> : vector<64x128xf32>
    %188 = tpu.matmul %185, %187, %cst_103 {dimension_numbers = #tpu.dot_dimension_numbers<[1], [0], [0], [1], [0, 0, 1, 1], [], []>} : vector<64x128xbf16>, vector<128x128xbf16>, vector<64x128xf32> -> vector<64x128xf32>
    %c2 = arith.constant 2 : index
    %c0_104 = arith.constant 0 : index
    %189 = vector.load %arg5[%c2, %c0_104] : memref<3x128xf32, #tpu.memory_space<vmem>>, vector<1x128xf32>
    %190 = vector.broadcast %189 : vector<1x128xf32> to vector<64x128xf32>
    %191 = arith.addf %188, %190 : vector<64x128xf32>
    %c0_105 = arith.constant 0 : index
    %c0_106 = arith.constant 0 : index
    %192 = vector.load %arg9[%c0_105, %c0_106] : memref<64x128xf32, #tpu.memory_space<vmem>>, vector<64x128xf32>
    tpu.vector_store %arg9[%c0_105, %c0_106], %191 {strides = array<i32>} : memref<64x128xf32, #tpu.memory_space<vmem>>, vector<64x128xf32>,
    %c2_107 = arith.constant 2 : index
    %c0_108 = arith.constant 0 : index
    %c0_109 = arith.constant 0 : index
    %193 = vector.load %arg4[%c2_107, %c0_108, %c0_109] : memref<3x128x128xbf16, #tpu.memory_space<vmem>>, vector<1x128x128xbf16>
    %194 = vector.shape_cast %193 : vector<1x128x128xbf16> to vector<128x128xbf16>
    %cst_110 = arith.constant 0.000000e+00 : f32
    %195 = vector.broadcast %cst_110 : f32 to vector<8x128xf32>
    %c0_i32_111 = arith.constant 0 : i32
    %c8_i32_112 = arith.constant 8 : i32
    %196 = arith.muli %c0_i32_111, %c8_i32_112 : i32
    %197 = tpu.assume_multiple %196, 8 : i32
    %198 = arith.index_cast %197 : i32 to index
    %c0_113 = arith.constant 0 : index
    %199 = vector.load %arg9[%198, %c0_113] : memref<64x128xf32, #tpu.memory_space<vmem>>, vector<8x128xf32>
    %200 = arith.truncf %195 : vector<8x128xf32> to vector<8x128xbf16>
    %cst_114 = arith.constant dense<0.000000e+00> : vector<8x128xf32>
    %201 = tpu.matmul %200, %194, %cst_114 {dimension_numbers = #tpu.dot_dimension_numbers<[1], [0], [0], [1], [0, 0, 1, 1], [], []>} : vector<8x128xbf16>, vector<128x128xbf16>, vector<8x128xf32> -> vector<8x128xf32>
    %202 = arith.addf %199, %201 : vector<8x128xf32>
    %203 = math.tanh %202 : vector<8x128xf32>
    %c1_i32_115 = arith.constant 1 : i32
    %c8_i32_116 = arith.constant 8 : i32
    %204 = arith.muli %c1_i32_115, %c8_i32_116 : i32
    %205 = tpu.assume_multiple %204, 8 : i32
    %206 = arith.index_cast %205 : i32 to index
    %c0_117 = arith.constant 0 : index
    %207 = vector.load %arg9[%206, %c0_117] : memref<64x128xf32, #tpu.memory_space<vmem>>, vector<8x128xf32>
    %208 = arith.truncf %203 : vector<8x128xf32> to vector<8x128xbf16>
    %cst_118 = arith.constant dense<0.000000e+00> : vector<8x128xf32>
    %209 = tpu.matmul %208, %194, %cst_118 {dimension_numbers = #tpu.dot_dimension_numbers<[1], [0], [0], [1], [0, 0, 1, 1], [], []>} : vector<8x128xbf16>, vector<128x128xbf16>, vector<8x128xf32> -> vector<8x128xf32>
    %210 = arith.addf %207, %209 : vector<8x128xf32>
    %211 = math.tanh %210 : vector<8x128xf32>
    %c2_i32_119 = arith.constant 2 : i32
    %c8_i32_120 = arith.constant 8 : i32
    %212 = arith.muli %c2_i32_119, %c8_i32_120 : i32
    %213 = tpu.assume_multiple %212, 8 : i32
    %214 = arith.index_cast %213 : i32 to index
    %c0_121 = arith.constant 0 : index
    %215 = vector.load %arg9[%214, %c0_121] : memref<64x128xf32, #tpu.memory_space<vmem>>, vector<8x128xf32>
    %216 = arith.truncf %211 : vector<8x128xf32> to vector<8x128xbf16>
    %cst_122 = arith.constant dense<0.000000e+00> : vector<8x128xf32>
    %217 = tpu.matmul %216, %194, %cst_122 {dimension_numbers = #tpu.dot_dimension_numbers<[1], [0], [0], [1], [0, 0, 1, 1], [], []>} : vector<8x128xbf16>, vector<128x128xbf16>, vector<8x128xf32> -> vector<8x128xf32>
    %218 = arith.addf %215, %217 : vector<8x128xf32>
    %219 = math.tanh %218 : vector<8x128xf32>
    %c3_i32_123 = arith.constant 3 : i32
    %c8_i32_124 = arith.constant 8 : i32
    %220 = arith.muli %c3_i32_123, %c8_i32_124 : i32
    %221 = tpu.assume_multiple %220, 8 : i32
    %222 = arith.index_cast %221 : i32 to index
    %c0_125 = arith.constant 0 : index
    %223 = vector.load %arg9[%222, %c0_125] : memref<64x128xf32, #tpu.memory_space<vmem>>, vector<8x128xf32>
    %224 = arith.truncf %219 : vector<8x128xf32> to vector<8x128xbf16>
    %cst_126 = arith.constant dense<0.000000e+00> : vector<8x128xf32>
    %225 = tpu.matmul %224, %194, %cst_126 {dimension_numbers = #tpu.dot_dimension_numbers<[1], [0], [0], [1], [0, 0, 1, 1], [], []>} : vector<8x128xbf16>, vector<128x128xbf16>, vector<8x128xf32> -> vector<8x128xf32>
    %226 = arith.addf %223, %225 : vector<8x128xf32>
    %227 = math.tanh %226 : vector<8x128xf32>
    %c4_i32_127 = arith.constant 4 : i32
    %c8_i32_128 = arith.constant 8 : i32
    %228 = arith.muli %c4_i32_127, %c8_i32_128 : i32
    %229 = tpu.assume_multiple %228, 8 : i32
    %230 = arith.index_cast %229 : i32 to index
    %c0_129 = arith.constant 0 : index
    %231 = vector.load %arg9[%230, %c0_129] : memref<64x128xf32, #tpu.memory_space<vmem>>, vector<8x128xf32>
    %232 = arith.truncf %227 : vector<8x128xf32> to vector<8x128xbf16>
    %cst_130 = arith.constant dense<0.000000e+00> : vector<8x128xf32>
    %233 = tpu.matmul %232, %194, %cst_130 {dimension_numbers = #tpu.dot_dimension_numbers<[1], [0], [0], [1], [0, 0, 1, 1], [], []>} : vector<8x128xbf16>, vector<128x128xbf16>, vector<8x128xf32> -> vector<8x128xf32>
    %234 = arith.addf %231, %233 : vector<8x128xf32>
    %235 = math.tanh %234 : vector<8x128xf32>
    %c5_i32_131 = arith.constant 5 : i32
    %c8_i32_132 = arith.constant 8 : i32
    %236 = arith.muli %c5_i32_131, %c8_i32_132 : i32
    %237 = tpu.assume_multiple %236, 8 : i32
    %238 = arith.index_cast %237 : i32 to index
    %c0_133 = arith.constant 0 : index
    %239 = vector.load %arg9[%238, %c0_133] : memref<64x128xf32, #tpu.memory_space<vmem>>, vector<8x128xf32>
    %240 = arith.truncf %235 : vector<8x128xf32> to vector<8x128xbf16>
    %cst_134 = arith.constant dense<0.000000e+00> : vector<8x128xf32>
    %241 = tpu.matmul %240, %194, %cst_134 {dimension_numbers = #tpu.dot_dimension_numbers<[1], [0], [0], [1], [0, 0, 1, 1], [], []>} : vector<8x128xbf16>, vector<128x128xbf16>, vector<8x128xf32> -> vector<8x128xf32>
    %242 = arith.addf %239, %241 : vector<8x128xf32>
    %243 = math.tanh %242 : vector<8x128xf32>
    %c6_i32_135 = arith.constant 6 : i32
    %c8_i32_136 = arith.constant 8 : i32
    %244 = arith.muli %c6_i32_135, %c8_i32_136 : i32
    %245 = tpu.assume_multiple %244, 8 : i32
    %246 = arith.index_cast %245 : i32 to index
    %c0_137 = arith.constant 0 : index
    %247 = vector.load %arg9[%246, %c0_137] : memref<64x128xf32, #tpu.memory_space<vmem>>, vector<8x128xf32>
    %248 = arith.truncf %243 : vector<8x128xf32> to vector<8x128xbf16>
    %cst_138 = arith.constant dense<0.000000e+00> : vector<8x128xf32>
    %249 = tpu.matmul %248, %194, %cst_138 {dimension_numbers = #tpu.dot_dimension_numbers<[1], [0], [0], [1], [0, 0, 1, 1], [], []>} : vector<8x128xbf16>, vector<128x128xbf16>, vector<8x128xf32> -> vector<8x128xf32>
    %250 = arith.addf %247, %249 : vector<8x128xf32>
    %251 = math.tanh %250 : vector<8x128xf32>
    %c7_i32_139 = arith.constant 7 : i32
    %c8_i32_140 = arith.constant 8 : i32
    %252 = arith.muli %c7_i32_139, %c8_i32_140 : i32
    %253 = tpu.assume_multiple %252, 8 : i32
    %254 = arith.index_cast %253 : i32 to index
    %c0_141 = arith.constant 0 : index
    %255 = vector.load %arg9[%254, %c0_141] : memref<64x128xf32, #tpu.memory_space<vmem>>, vector<8x128xf32>
    %256 = arith.truncf %251 : vector<8x128xf32> to vector<8x128xbf16>
    %cst_142 = arith.constant dense<0.000000e+00> : vector<8x128xf32>
    %257 = tpu.matmul %256, %194, %cst_142 {dimension_numbers = #tpu.dot_dimension_numbers<[1], [0], [0], [1], [0, 0, 1, 1], [], []>} : vector<8x128xbf16>, vector<128x128xbf16>, vector<8x128xf32> -> vector<8x128xf32>
    %258 = arith.addf %255, %257 : vector<8x128xf32>
    %259 = math.tanh %258 : vector<8x128xf32>
    %c8_i32_143 = arith.constant 8 : i32
    %260 = arith.truncf %259 : vector<8x128xf32> to vector<8x128xbf16>
    %c0_144 = arith.constant 0 : index
    %c0_145 = arith.constant 0 : index
    %261 = vector.load %arg6[%c0_144, %c0_145] : memref<128x128xbf16, #tpu.memory_space<vmem>>, vector<128x128xbf16>
    %cst_146 = arith.constant dense<0.000000e+00> : vector<8x128xf32>
    %262 = tpu.matmul %260, %261, %cst_146 {dimension_numbers = #tpu.dot_dimension_numbers<[1], [0], [0], [1], [0, 0, 1, 1], [], []>} : vector<8x128xbf16>, vector<128x128xbf16>, vector<8x128xf32> -> vector<8x128xf32>
    %c0_147 = arith.constant 0 : index
    %c0_148 = arith.constant 0 : index
    %263 = vector.load %arg7[%c0_147, %c0_148] : memref<1x128xf32, #tpu.memory_space<vmem>>, vector<1x128xf32>
    %264 = vector.broadcast %263 : vector<1x128xf32> to vector<8x128xf32>
    %265 = arith.addf %262, %264 : vector<8x128xf32>
    %cst_149 = arith.constant 0.000000e+00 : f32
    %266 = vector.broadcast %cst_149 : f32 to vector<8x128xf32>
    %267 = arith.maximumf %265, %266 : vector<8x128xf32>
    %c0_150 = arith.constant 0 : index
    %c0_151 = arith.constant 0 : index
    %268 = vector.load %arg8[%c0_150, %c0_151] : memref<8x128xf32, #tpu.memory_space<vmem>>, vector<8x128xf32>
    tpu.vector_store %arg8[%c0_150, %c0_151], %267 {strides = array<i32>} : memref<8x128xf32, #tpu.memory_space<vmem>>, vector<8x128xf32>,
    return
  }
  func.func @transform_0(%arg0: i32) -> (i32, i32, i32) {
    %c0_i32 = arith.constant 0 : i32
    %c0_i32_0 = arith.constant 0 : i32
    %c0_i32_1 = arith.constant 0 : i32
    return %c0_i32, %arg0, %c0_i32_0 : i32, i32, i32
  }
  func.func @transform_1(%arg0: i32) -> (i32, i32) {
    %c0_i32 = arith.constant 0 : i32
    %c0_i32_0 = arith.constant 0 : i32
    %c0_i32_1 = arith.constant 0 : i32
    return %c0_i32, %c0_i32_0 : i32, i32
  }
  func.func @transform_2(%arg0: i32) -> (i32, i32, i32) {
    %c0_i32 = arith.constant 0 : i32
    %c0_i32_0 = arith.constant 0 : i32
    %c0_i32_1 = arith.constant 0 : i32
    %c0_i32_2 = arith.constant 0 : i32
    return %c0_i32, %c0_i32_0, %c0_i32_1 : i32, i32, i32
  }
  func.func @transform_3(%arg0: i32) -> (i32, i32, i32) {
    %c0_i32 = arith.constant 0 : i32
    %c0_i32_0 = arith.constant 0 : i32
    %c0_i32_1 = arith.constant 0 : i32
    %c0_i32_2 = arith.constant 0 : i32
    return %c0_i32, %c0_i32_0, %c0_i32_1 : i32, i32, i32
  }
  func.func @transform_4(%arg0: i32) -> (i32, i32) {
    %c0_i32 = arith.constant 0 : i32
    %c0_i32_0 = arith.constant 0 : i32
    %c0_i32_1 = arith.constant 0 : i32
    return %c0_i32, %c0_i32_0 : i32, i32
  }
  func.func @transform_5(%arg0: i32) -> (i32, i32) {
    %c0_i32 = arith.constant 0 : i32
    %c0_i32_0 = arith.constant 0 : i32
    %c0_i32_1 = arith.constant 0 : i32
    return %c0_i32, %c0_i32_0 : i32, i32
  }
  func.func @transform_6(%arg0: i32) -> (i32, i32) {
    %c0_i32 = arith.constant 0 : i32
    %c0_i32_0 = arith.constant 0 : i32
    %c0_i32_1 = arith.constant 0 : i32
    return %c0_i32, %c0_i32_0 : i32, i32
  }
  func.func @transform_7(%arg0: i32) -> (i32, i32) {
    %c0_i32 = arith.constant 0 : i32
    %c0_i32_0 = arith.constant 0 : i32
    return %arg0, %c0_i32 : i32, i32
  }
}

</mosaic_0001>

<bundles_post_ra>
// kernel: tpu_custom_call.1
= control target key start
LH: loop header
LB: loop body
LE: loop exit
PB: predicated region body
PF: predicated region fallthrough
CT: control target
= control target key end

     0   :  { %s2775_s0 = inlined_call_operand.hbm [shape: f32[8,32,128], index: 0, kind: input, shape index: {}]   ;;  %s2776_s1 = inlined_call_operand.hbm [shape: bf16[128,128], index: 1, kind: input, shape index: {}]   ;;  %s2777_s2 = inlined_call_operand.hbm [shape: bf16[2,128,128], index: 2, kind: input, shape index: {}]   ;;  %s2778_s3 = inlined_call_operand.hbm [shape: bf16[3,128,128], index: 3, kind: input, shape index: {}]   ;;  %s2779_s4 = inlined_call_operand.hbm [shape: f32[3,128], index: 4, kind: input, shape index: {}]   ;;  %s2780_s5 = inlined_call_operand.hbm [shape: bf16[128,128], index: 5, kind: input, shape index: {}]   ;;  %s2781_s6 = inlined_call_operand.vmem [shape: f32[1,128], index: 6, kind: input, shape index: {}]   ;;  %s2782_s7 = inlined_call_operand.hbm [shape: f32[32,128], index: 7, kind: output, shape index: {}]  }
   0x1   :  { %2783 = sst [smem:[#allocation21_spill]] %s2776_s1 }
   0x2   :  { %2784 = sst [smem:[#allocation22_spill]] %s2777_s2 }
   0x3   :  { %12 = vsyncpa [#allocation5], 0 }
   0x4   :  { %14 = vsyncpa [#allocation5 + $0x1], 0 }
   0x5   :  { %15 = vsyncpa [#allocation8], 0 }
   0x6   :  { %16 = vsyncpa [#allocation11], 0 }
   0x7   :  { %17 = vsyncpa [#allocation14], 0 }
   0x8   :  { %18 = vsyncpa [#allocation6], 0 }
   0x9   :  { %20 = vsyncpa [#allocation6 + $0x1], 0  ;;  %s2341_s24 = smov 0   ;;  %s2343_s25 = smov 0  }
   0xa   :  { %s2345_s26 = smov 0   ;;  %s2347_s27 = smov 0  }
   0xb LB: > { %s2362_s28 = sadd.s32 4294967295, %s2288_s27   ;;  %s1573_s29 = sadd.s32 4294967294, %s2288_s27   ;;  %s2288_s27 = sphi %s2347_s27, %s2796_s27   ;;  %s2284_s26 = sphi %s2345_s26, %s2795_s26   ;;  %s2280_s25 = sphi %s2343_s25, %s2794_s25   ;;  %s2276_s24 = sphi %s2341_s24, %s2793_s24  }
   0xc   : > { %p46_p0 = scmp.ne.s32.totalorder %s2280_s25, %s2276_s24  ;;  %p47_p1 = scmp.eq.s32.totalorder %s2362_s28, 0 }
   0xd   : > { %p196_p2 = scmp.eq.s32.totalorder %s2362_s28, 3  ;;  %p202_p3 = scmp.eq.s32.totalorder %s1573_s29, 3 }
   0xe   : > { %p2371_p4 = por %p47_p1, %p46_p0  ;;  %p1574_p5 = scmp.ge.s32.totalorder %s2288_s27, 1 }
   0xf   : > { %p2376_p6 = por %p202_p3, %p46_p0  ;;  %p209_p7 = scmp.lt.s32.totalorder %s2288_s27, 5 }
  0x10   : > { %s2787_s1 = sld [smem:[#allocation21_spill]]  ;;  %s2290_s13 = smov [#allocation7]  }
  0x11   : > { %p2384_p8 = pnand %p1574_p5, %p209_p7  ;;  %s222_s14 = sshll.u32 %s2290_s13, 4  ;;  %s223_s14 = int_to_ptr.vmem [resolvable:$true] %s222_s14 }
  0x12   : > { %s248_s18 = sshll.u32 %s2778_s3, 4  ;;  %s2291_s19 = smov 64   ;;  %s249_s18 = int_to_ptr.hbm [resolvable:$true] %s248_s18 }
  0x13   : > { %p1899_p9 = pneg %p2384_p8  ;;  %s2292_s20 = smov 4  }
  0x14   : > { %s2293_s21 = smov [#allocation10]   ;;  %s2790_s2 = sld [smem:[#allocation22_spill]] }
  0x15   : > { %p2392_p10 = pnand %p1899_p9, %p47_p1  ;;  %s250_s22 = sshll.u32 %s2293_s21, 4  ;;  %s251_s22 = int_to_ptr.vmem [resolvable:$true] %s250_s22 }
  0x16   : > { %s220_s11 = sshll.u32 %s2787_s1, 4  ;;  %s263_s16 = sshll.u32 %s2779_s4, 4  ;;  %s221_s11 = int_to_ptr.hbm [resolvable:$true] %s220_s11  ;;  %s264_s16 = int_to_ptr.hbm [resolvable:$true] %s263_s16 }
  0x17   : > { %1902 = dma.hbm_to_vmem [thread:$0]  (!%p2392_p10), %s221_s11, 1024, %s223_s14, [#allocation8], %s2291_s19, %s2291_s19, %s2292_s20  }
  0x18   : > { %1908 = dma.hbm_to_vmem [thread:$0]  (!%p2392_p10), %s249_s18, 3072, %s251_s22, [#allocation11], %s2291_s19, %s2291_s19, %s2292_s20  }
  0x19   : > { %s2294_s17 = smov [#allocation9]   ;;  %s2295_s14 = smov [#allocation12]  }
  0x1a   : > { %s234_s9 = sshll.u32 %s2790_s2, 4  ;;  %s236_s11 = sshll.u32 %s2294_s17, 4  ;;  %s235_s9 = int_to_ptr.hbm [resolvable:$true] %s234_s9  ;;  %s237_s11 = int_to_ptr.vmem [resolvable:$true] %s236_s11 }
  0x1b   : > { %1905 = dma.hbm_to_vmem [thread:$0]  (!%p2392_p10), %s235_s9, 2048, %s237_s11, [#allocation8], %s2291_s19, %s2291_s19, %s2292_s20  }
  0x1c   : > { %s265_s18 = sshll.u32 %s2295_s14, 4  ;;  %s274_s23 = sshll.u32 %s2780_s5, 4  ;;  %s266_s18 = int_to_ptr.vmem [resolvable:$true] %s265_s18  ;;  %s275_s23 = int_to_ptr.hbm [resolvable:$true] %s274_s23 }
  0x1d   : > { %1911 = dma.hbm_to_vmem [thread:$0]  (!%p2392_p10), %s264_s16, 64, %s266_s18, [#allocation11]  }
  0x1e   : > { %s2296_s29 = smov [#allocation13]   ;;  %s2417_s9 = sadd.s32 1, %s2288_s27  }
  0x1f   : > { %s276_s10 = sshll.u32 %s2296_s29, 4  ;;  %s30_s13 = ssub.s32 %s2288_s27, %s2417_s9  ;;  %s277_s10 = int_to_ptr.vmem [resolvable:$true] %s276_s10 }
  0x20   : > { %1914 = dma.hbm_to_vmem [thread:$0]  (!%p2392_p10), %s275_s23, 1024, %s277_s10, [#allocation14], %s2291_s19, %s2291_s19, %s2292_s20  }
  0x21   : > { %s33_s17 = sadd.s32 1, %s2284_s26  ;;  %p31_p11 = scmp.eq.s32.totalorder %s30_s13, 0 }
  0x22   : > { %p40_p12 = scmp.ne.s32.totalorder %s2284_s26, %s2280_s25  ;;  %p41_p13 = scmp.eq.s32.totalorder %s2288_s27, 0 }
  0x23   : > { %p1928_p0 = scmp.lt.s32.totalorder %s2288_s27, 4  ;;  %s293_s14 = sand.u32 1, %s2284_s26  }
  0x24   : > { %s2429_s11 = scalar_select %p31_p11, %s2284_s26, %s33_s17  }
  0x25   : > { %p42_p3 = por %p41_p13, %p40_p12  ;;  %p2433_p5 = por %p196_p2, %p40_p12 }
  0x26   : > { %s1582_s18 = sshll.u32 %s2288_s27, 3  ;;  %s1581_s15 = sshll.u32 %s293_s14, 6 }
  0x27   : > { %s301_s20 = scalar_lea.hbm %s2775_s0, %s1582_s18  ;;  %s297_s23 = scalar_lea.vmem [#allocation4], %s1581_s15 }
  0x28   : > { %s302_s22 = sshll.u32 %s301_s20, 4  ;;  %s304_s29 = sshll.u32 %s297_s23, 4  ;;  %s303_s22 = int_to_ptr.hbm [resolvable:$true] %s302_s22  ;;  %s305_s29 = int_to_ptr.vmem [resolvable:$true] %s304_s29 }
  0x29   : > { %p2444_p7 = pnand %p1928_p0, %p42_p3  ;;  %s294_s13 = scalar_lea.sflag [#allocation5], %s293_s14 }
  0x2a   : > { %s2180_s17 = sshra.s32 %s303_s22, 4  ;;  %s2187_s21 = scalar_lea.hbm %s2775_s0, 256  ;;  %s2181_s17 = int_to_ptr.hbm [resolvable:$true] %s2180_s17 }
  0x2b   : > { %s2182_s1 = scalar_lea.hbm %s2181_s17, 64  ;;  %p2184_p9 = pneg %p2444_p7 }
  0x2c   : > { %p2183_p2 = scmp.ne.s32.totalorder %s2181_s17, %s2182_s1  ;;  %p2188_p12 = scmp.lt.s32.totalorder %s2181_s17, %s2775_s0 }
  0x2d   : > { %p2189_p13 = scmp.lt.s32.totalorder %s2187_s21, %s2182_s1 }
  0x2e   : > { %p2185_p10 = pnand %p2184_p9, %p2183_p2 }
  0x2f   : > { %p2190_p0 = por %p2189_p13, %p2188_p12 }
  0x30   : > { %p2186_p11 = pneg %p2185_p10 }
  0x32   : > { %p2191_p3 = pnand %p2190_p0, %p2186_p11 }
  0x34   : > { %2194 = shalt.err (!%p2191_p3)
}
  0x35   : > { %s2297_s14 = smov 512   ;;  %s2298_s23 = smov 128  }
  0x36   : > { %s2299_s2 = smov 8   ;;  %316 = sbr.rel (%p2384_p8) target bundleno = 2792 (0xae8), region = 48 }
  0x37   : > { %1918 = dma.hbm_to_vmem [thread:$0]  (!%p2444_p7), %s303_s22, 1024, %s305_s29, %s294_s13, %s2297_s14, %s2298_s23, %s2299_s2  }
  0x38   : > { %s2461_s18 = sand.u32 (!%p2384_p8), 1, %s2280_s25  }
  0x39   : > { %s1584_s17 = sshll.u32 (!%p2384_p8), %s2461_s18, 6  ;;  %s319_s1 = scalar_lea.sflag (!%p2384_p8), [#allocation5], %s2461_s18 }
  0x3a   : > { %s2465_s15 = scalar_lea.vmem (!%p2384_p8), [#allocation4], %s1584_s17 }
  0x3b   : > { %2255 = dma.done.wait (%p2371_p4), %s319_s1, 1024  }
  0x3c   : > { %2257 = vsyncadd (%p2371_p4), %s319_s1, 4294966272 }
  0x3d   : > { %2259 = dma.done.wait (%p47_p1), [#allocation8], 3072  }
  0x3e   : > { %2261 = vsyncadd (%p47_p1), [#allocation8], 4294964224 }
  0x3f   : > { %2263 = dma.done.wait (%p47_p1), [#allocation11], 3136  }
  0x40   : > { %2265 = vsyncadd (%p47_p1), [#allocation11], 4294964160 }
  0x41   : > { %2267 = dma.done.wait (%p47_p1), [#allocation14], 1024  }
  0x42   : > { %2269 = vsyncadd (%p47_p1), [#allocation14], 4294966272  ;;  %v1826_v0 = vld [vmem:[#allocation7 + $0x38] sm:$0xff]  ;;  %v1825_v2 = vld [vmem:[#allocation7 + $0x30] sm:$0xff]  ;;  %v2300_v19 = vmov 0   ;;  %s1590_s2 = sshll.u32 %s2461_s18, 3 }
  0x43   : > { %v2483_v1 = vld [vmem:[#allocation10 + $0x38] sm:$0xff]  ;;  %458 = vmatpush.bf16.msra.mxu0 %v1826_v0  ;;  %v2486_v3 = vld [vmem:[#allocation10 + $0x30] sm:$0xff]  ;;  %v1824_v4 = vld [vmem:[#allocation7 + $0x28] sm:$0xff]  ;;  %s1816_s30 = sshll.u32 %s2362_s28, 3  ;;  %s378_s21 = scalar_lea.vmem [#allocation15], %s1590_s2 }
  0x44   : > { %560 = vmatpush.bf16.msra.mxu1 %v2483_v1  ;;  %579 = vmatpush.bf16.msra.mxu2 %v2483_v1  ;;  %v2491_v5 = vld [vmem:[#allocation10 + $0x28] sm:$0xff]  ;;  %v1823_v6 = vld [vmem:[#allocation7 + $0x20] sm:$0xff]  ;;  %v1822_v8 = vld [vmem:[#allocation7 + $0x18] sm:$0xff]  ;;  %s1450_s13 = scalar_lea.hbm %s2782_s7, %s1816_s30  ;;  %s1452_s19 = sshll.u32 %s378_s21, 4  ;;  %s1453_s19 = int_to_ptr.vmem [resolvable:$true] %s1452_s19 }
  0x45   : > { %599 = vmatpush.bf16.msra.mxu3 %v2483_v1  ;;  %v2496_v7 = vld [vmem:[#allocation10 + $0x20] sm:$0xff]  ;;  %v2501_v9 = vld [vmem:[#allocation10 + $0x18] sm:$0xff]  ;;  %v1821_v10 = vld [vmem:[#allocation7 + $0x10] sm:$0xff]  ;;  %s1454_s20 = sshll.u32 %s1450_s13, 4  ;;  %s1440_s14 = scalar_lea.sflag [#allocation6], %s2461_s18  ;;  %s1455_s20 = int_to_ptr.hbm [resolvable:$true] %s1454_s20 }
  0x46   : > { %v1829_v11 = vld [vmem:[#allocation10 + $0x10] sm:$0xff]  ;;  %v1820_v12 = vld [vmem:[#allocation7 + $0x8] sm:$0xff]  ;;  %v1819_v14 = vld [vmem:[#allocation7] sm:$0xff]  ;;  %s2224_s28 = sshra.s32 %s1455_s20, 4  ;;  %s2225_s28 = int_to_ptr.hbm [resolvable:$true] %s2224_s28 }
  0x47   : > { %459 = vmatpush.bf16.msra.mxu0 %v1825_v2  ;;  %v1828_v13 = vld [vmem:[#allocation10 + $0x8] sm:$0xff]  ;;  %v1827_v15 = vld [vmem:[#allocation10] sm:$0xff]  ;;  %v382_v28 = vld [vmem:[%s2465_s15 + $0x10] sm:$0xff]  ;;  %s2226_s23 = scalar_lea.hbm %s2225_s28, 8  ;;  %p2231_p7 = scmp.lt.s32.totalorder %s2225_s28, %s2782_s7 }
  0x48   : > { %561 = vmatpush.bf16.msra.mxu1 %v2486_v3  ;;  %580 = vmatpush.bf16.msra.mxu2 %v2486_v3  ;;  %v380_v16 = vld [vmem:[%s2465_s15] sm:$0xff]  ;;  %v381_v17 = vld [vmem:[%s2465_s15 + $0x8] sm:$0xff]  ;;  %v383_v29 = vld [vmem:[%s2465_s15 + $0x18] sm:$0xff]  ;;  %p2227_p1 = scmp.ne.s32.totalorder %s2225_s28, %s2226_s23 }
  0x49   : > { %600 = vmatpush.bf16.msra.mxu3 %v2486_v3  ;;  %v388_v18 = vpack.c.bf16 %v381_v17, %v380_v16  ;;  %v2536_v20 = vld [vmem:[#allocation12] ss:$0 sm:$0xff]  ;;  %v389_v30 = vpack.c.bf16 %v383_v29, %v382_v28  ;;  %v1842_v38 = vld [vmem:[#allocation9 + $0x38] sm:$0xff]  ;;  %v1841_v46 = vld [vmem:[#allocation9 + $0x30] sm:$0xff] }
  0x4a   : > { %v1840_v47 = vld [vmem:[#allocation9 + $0x28] sm:$0xff]  ;;  %v384_v48 = vld [vmem:[%s2465_s15 + $0x20] sm:$0xff]  ;;  %v1838_v52 = vld [vmem:[#allocation9 + $0x18] sm:$0xff]  ;;  %p2228_p4 = pnand %p2227_p1, %p2433_p5 }
  0x4b   : > { %460 = vmatpush.bf16.msra.mxu0 %v1824_v4  ;;  %v385_v49 = vld [vmem:[%s2465_s15 + $0x28] sm:$0xff]  ;;  %v1839_v51 = vld [vmem:[#allocation9 + $0x20] sm:$0xff]  ;;  %v1837_v53 = vld [vmem:[#allocation9 + $0x10] sm:$0xff] }
  0x4c   : > { %562 = vmatpush.bf16.msra.mxu1 %v2491_v5  ;;  %581 = vmatpush.bf16.msra.mxu2 %v2491_v5  ;;  %v390_v50 = vpack.c.bf16 %v385_v49, %v384_v48  ;;  %v1836_v54 = vld [vmem:[#allocation9 + $0x8] sm:$0xff]  ;;  %v1835_v55 = vld [vmem:[#allocation9] sm:$0xff]  ;;  %v2552_v2 = vld [vmem:[#allocation10 + $0x70] sm:$0xff]  ;;  %p2229_p8 = pneg %p2228_p4 }
  0x4d   : > { %601 = vmatpush.bf16.msra.mxu3 %v2491_v5  ;;  %v2564_v4 = vld [vmem:[#allocation10 + $0x60] sm:$0xff]  ;;  %v387_v16 = vld [vmem:[%s2465_s15 + $0x38] sm:$0xff] }
  0x4e   : > { %v2615_v29 = vld [vmem:[#allocation12 + $0x1] ss:$0 sm:$0xff] }
  0x4f   : > { %461 = vmatpush.bf16.msra.mxu0 %v1823_v6  ;;  %v2576_v6 = vld [vmem:[#allocation10 + $0x50] sm:$0xff] }
  0x50   : > { %563 = vmatpush.bf16.msra.mxu1 %v2496_v7  ;;  %582 = vmatpush.bf16.msra.mxu2 %v2496_v7 }
  0x51   : > { %602 = vmatpush.bf16.msra.mxu3 %v2496_v7 }
  0x53   : > { %462 = vmatpush.bf16.msra.mxu0 %v1822_v8  ;;  %v2588_v8 = vld [vmem:[#allocation10 + $0x40] sm:$0xff] }
  0x54   : > { %564 = vmatpush.bf16.msra.mxu1 %v2501_v9  ;;  %583 = vmatpush.bf16.msra.mxu2 %v2501_v9 }
  0x55   : > { %603 = vmatpush.bf16.msra.mxu3 %v2501_v9 }
  0x57   : > { %463 = vmatpush.bf16.msra.mxu0 %v1821_v10 }
  0x58   : > { %565 = vmatpush.bf16.msra.mxu1 %v1829_v11  ;;  %584 = vmatpush.bf16.msra.mxu2 %v1829_v11 }
  0x59   : > { %604 = vmatpush.bf16.msra.mxu3 %v1829_v11 }
  0x5b   : > { %464 = vmatpush.bf16.msra.mxu0 %v1820_v12 }
  0x5c   : > { %566 = vmatpush.bf16.msra.mxu1 %v1828_v13  ;;  %585 = vmatpush.bf16.msra.mxu2 %v1828_v13 }
  0x5d   : > { %605 = vmatpush.bf16.msra.mxu3 %v1828_v13 }
  0x5f   : > { %465 = vmatpush.bf16.msra.mxu0 %v1819_v14 }
  0x60   : > { %567 = vmatpush.bf16.msra.mxu1 %v1827_v15  ;;  %586 = vmatpush.bf16.msra.mxu2 %v1827_v15 }
  0x61   : > { %606 = vmatpush.bf16.msra.mxu3 %v1827_v15 }
  0x62   : > { %466 = vmatmul.bf16.vlgmr.msra.gmra.mxu0 %v388_v18 }
  0x63   : > { %568 = vmatmul.bf16.vlgmr.msra.gmra.mxu1 %v2300_v19  ;;  %679 = vmatpush.bf16.msrb.mxu0 %v2483_v1 }
  0x64   : > { %619 = vmatpush.bf16.msrb.mxu1 %v2483_v1  ;;  %639 = vmatpush.bf16.msrb.mxu2 %v2483_v1 }
  0x65   : > { %659 = vmatpush.bf16.msrb.mxu3 %v2483_v1 }
  0x67   : > { %680 = vmatpush.bf16.msrb.mxu0 %v2486_v3 }
  0x68   : > { %620 = vmatpush.bf16.msrb.mxu1 %v2486_v3  ;;  %640 = vmatpush.bf16.msrb.mxu2 %v2486_v3 }
  0x69   : > { %660 = vmatpush.bf16.msrb.mxu3 %v2486_v3 }
  0x6b   : > { %681 = vmatpush.bf16.msrb.mxu0 %v2491_v5 }
  0x6c   : > { %621 = vmatpush.bf16.msrb.mxu1 %v2491_v5  ;;  %641 = vmatpush.bf16.msrb.mxu2 %v2491_v5 }
  0x6d   : > { %661 = vmatpush.bf16.msrb.mxu3 %v2491_v5 }
  0x6f   : > { %682 = vmatpush.bf16.msrb.mxu0 %v2496_v7 }
  0x70   : > { %622 = vmatpush.bf16.msrb.mxu1 %v2496_v7  ;;  %642 = vmatpush.bf16.msrb.mxu2 %v2496_v7 }
  0x71   : > { %662 = vmatpush.bf16.msrb.mxu3 %v2496_v7 }
  0x72   : > { %471 = vmatmul.bf16.gmra.mxu0 %v389_v30 }
  0x73   : > { %683 = vmatpush.bf16.msrb.mxu0 %v2501_v9 }
  0x74   : > { %623 = vmatpush.bf16.msrb.mxu1 %v2501_v9  ;;  %643 = vmatpush.bf16.msrb.mxu2 %v2501_v9 }
  0x75   : > { %663 = vmatpush.bf16.msrb.mxu3 %v2501_v9 }
  0x77   : > { %684 = vmatpush.bf16.msrb.mxu0 %v1829_v11 }
  0x78   : > { %624 = vmatpush.bf16.msrb.mxu1 %v1829_v11  ;;  %644 = vmatpush.bf16.msrb.mxu2 %v1829_v11 }
  0x79   : > { %664 = vmatpush.bf16.msrb.mxu3 %v1829_v11 }
  0x7b   : > { %685 = vmatpush.bf16.msrb.mxu0 %v1828_v13 }
  0x7c   : > { %625 = vmatpush.bf16.msrb.mxu1 %v1828_v13  ;;  %645 = vmatpush.bf16.msrb.mxu2 %v1828_v13 }
  0x7d   : > { %665 = vmatpush.bf16.msrb.mxu3 %v1828_v13 }
  0x7f   : > { %686 = vmatpush.bf16.msrb.mxu0 %v1827_v15 }
  0x80   : > { %626 = vmatpush.bf16.msrb.mxu1 %v1827_v15  ;;  %646 = vmatpush.bf16.msrb.mxu2 %v1827_v15 }
  0x81   : > { %666 = vmatpush.bf16.msrb.mxu3 %v1827_v15 }
  0x82   : > { %476 = vmatmul.bf16.gmra.mxu0 %v390_v50 }
  0x84   : > { %699 = vmatpush.bf16.msra.mxu1 %v2483_v1  ;;  %v2546_v1 = vld [vmem:[#allocation10 + $0x78] sm:$0xff] }
  0x85   : > { %915 = vmatpush.bf16.msra.mxu0 %v2546_v1 }
  0x88   : > { %700 = vmatpush.bf16.msra.mxu1 %v2486_v3  ;;  %v2558_v3 = vld [vmem:[#allocation10 + $0x68] sm:$0xff] }
  0x89   : > { %916 = vmatpush.bf16.msra.mxu0 %v2552_v2 }
  0x8c   : > { %701 = vmatpush.bf16.msra.mxu1 %v2491_v5  ;;  %v2570_v5 = vld [vmem:[#allocation10 + $0x58] sm:$0xff] }
  0x8d   : > { %917 = vmatpush.bf16.msra.mxu0 %v2558_v3 }
  0x90   : > { %702 = vmatpush.bf16.msra.mxu1 %v2496_v7  ;;  %v2579_v7 = vld [vmem:[#allocation10 + $0x48] sm:$0xff] }
  0x91   : > { %918 = vmatpush.bf16.msra.mxu0 %v2564_v4 }
  0x94   : > { %703 = vmatpush.bf16.msra.mxu1 %v2501_v9 }
  0x95   : > { %919 = vmatpush.bf16.msra.mxu0 %v2570_v5 }
  0x98   : > { %704 = vmatpush.bf16.msra.mxu1 %v1829_v11 }
  0x99   : > { %920 = vmatpush.bf16.msra.mxu0 %v2576_v6 }
  0x9c   : > { %705 = vmatpush.bf16.msra.mxu1 %v1828_v13 }
  0x9d   : > { %921 = vmatpush.bf16.msra.mxu0 %v2579_v7 }
  0xa0   : > { %706 = vmatpush.bf16.msra.mxu1 %v1827_v15  ;;  %v386_v15 = vld [vmem:[%s2465_s15 + $0x30] sm:$0xff]  ;;  %s2230_s15 = scalar_lea.hbm %s2782_s7, 32 }
  0xa1   : > { %922 = vmatpush.bf16.msra.mxu0 %v2588_v8  ;;  %v391_v18 = vpack.c.bf16 %v387_v16, %v386_v15  ;;  %v2643_v15 = vld [vmem:[#allocation10 + $0xb8] sm:$0xff]  ;;  %p2232_p2 = scmp.lt.s32.totalorder %s2230_s15, %s2226_s23 }
  0xa3   : > { %481 = vmatmul.bf16.gmra.mxu0 %v391_v18  ;;  %v2650_v18 = vld [vmem:[#allocation10 + $0xb0] sm:$0xff]  ;;  %p2233_p9 = por %p2232_p2, %p2231_p7 }
  0xa5   : > { %p2234_p10 = pnand %p2233_p9, %p2229_p8 }
  0xdf   : > { %v467_v21 = vpop.f32.mrf.mxu0 }
  0xe0   : > { %v569_v22 = vpop.f32.mrf.mxu1  ;;  %v468_v23 = vadd.f32 %v2536_v20, %v467_v21 }
  0xe2   : > { %v573_v24 = vadd.f32 %v569_v22, %v468_v23 }
  0xe4   : > { %1982 = vtanh.f32 %v573_v24 }
  0xe7   : > { %v469_v31 = vpop.f32.mrf.mxu0 }
  0xe8   : > { %v571_v25 = vpop.f32.mrf.mxu1  ;;  %v470_v32 = vadd.f32 %v2536_v20, %v469_v31 }
  0xea   : > { %v1983_v26 = vpop.eup %1982 }
  0xeb   : > { %v578_v27 = vpack.c.bf16 %v1983_v26, %v1983_v26 }
  0xed   : > { %587 = vmatmul.bf16.vlgmr.msra.gmra.mxu2 %v578_v27 }
  0xee   : > { %794 = vmatpush.bf16.msra.mxu2 %v1842_v38 }
  0xef   : > { %v472_v39 = vpop.f32.mrf.mxu0 }
  0xf0   : > { %v473_v40 = vadd.f32 %v2536_v20, %v472_v39 }
  0xf2   : > { %795 = vmatpush.bf16.msra.mxu2 %v1841_v46 }
  0xf6   : > { %796 = vmatpush.bf16.msra.mxu2 %v1840_v47 }
  0xf7   : > { %v474_v56 = vpop.f32.mrf.mxu0 }
  0xf8   : > { %v475_v57 = vadd.f32 %v2536_v20, %v474_v56 }
  0xfa   : > { %797 = vmatpush.bf16.msra.mxu2 %v1839_v51 }
  0xfe   : > { %798 = vmatpush.bf16.msra.mxu2 %v1838_v52 }
  0xff   : > { %v477_v9 = vpop.f32.mrf.mxu0 }
 0x100   : > { %v478_v10 = vadd.f32 %v2536_v20, %v477_v9 }
 0x102   : > { %799 = vmatpush.bf16.msra.mxu2 %v1837_v53 }
 0x106   : > { %800 = vmatpush.bf16.msra.mxu2 %v1836_v54 }
 0x107   : > { %v479_v21 = vpop.f32.mrf.mxu0 }
 0x108   : > { %v480_v22 = vadd.f32 %v2536_v20, %v479_v21  ;;  %v2656_v21 = vld [vmem:[#allocation10 + $0xa8] sm:$0xff] }
 0x10a   : > { %801 = vmatpush.bf16.msra.mxu2 %v1835_v55 }
 0x170   : > { %v588_v33 = vpop.f32.mrf.mxu2 }
 0x171   : > { %v592_v34 = vadd.f32 %v588_v33, %v470_v32 }
 0x173   : > { %1984 = vtanh.f32 %v592_v34 }
 0x178   : > { %v590_v35 = vpop.f32.mrf.mxu2 }
 0x179   : > { %v1985_v36 = vpop.eup %1984 }
 0x17a   : > { %v598_v37 = vpack.c.bf16 %v1985_v36, %v1985_v36  ;;  %v724_v63 = vpack.c.bf16 %v1985_v36, %v1983_v26 }
 0x17c   : > { %607 = vmatmul.bf16.vlgmr.msra.gmra.mxu3 %v598_v37  ;;  %v482_v37 = vpop.f32.mrf.mxu0 }
 0x17d   : > { %897 = vmatpush.bf16.msra.mxu3 %v2546_v1  ;;  %v483_v39 = vadd.f32 %v2536_v20, %v482_v37 }
 0x181   : > { %898 = vmatpush.bf16.msra.mxu3 %v2552_v2 }
 0x184   : > { %v484_v38 = vpop.f32.mrf.mxu0 }
 0x185   : > { %899 = vmatpush.bf16.msra.mxu3 %v2558_v3  ;;  %v485_v52 = vadd.f32 %v2536_v20, %v484_v38  ;;  %v1857_v20 = vld [vmem:[#allocation9 + $0x70] sm:$0xff] }
 0x189   : > { %900 = vmatpush.bf16.msra.mxu3 %v2564_v4 }
 0x18d   : > { %901 = vmatpush.bf16.msra.mxu3 %v2570_v5 }
 0x191   : > { %902 = vmatpush.bf16.msra.mxu3 %v2576_v6 }
 0x195   : > { %903 = vmatpush.bf16.msra.mxu3 %v2579_v7 }
 0x199   : > { %904 = vmatpush.bf16.msra.mxu3 %v2588_v8 }
 0x1ff   : > { %v608_v41 = vpop.f32.mrf.mxu3 }
 0x200   : > { %v612_v42 = vadd.f32 %v608_v41, %v473_v40 }
 0x202   : > { %1986 = vtanh.f32 %v612_v42 }
 0x207   : > { %v610_v43 = vpop.f32.mrf.mxu3 }
 0x208   : > { %v1987_v44 = vpop.eup %1986 }
 0x209   : > { %v618_v45 = vpack.c.bf16 %v1987_v44, %v1987_v44 }
 0x20b   : > { %627 = vmatmul.bf16.vlgmr.msrb.gmra.mxu1 %v618_v45 }
 0x20c   : > { %933 = vmatpush.bf16.msrb.mxu1 %v2546_v1 }
 0x210   : > { %934 = vmatpush.bf16.msrb.mxu1 %v2552_v2 }
 0x214   : > { %935 = vmatpush.bf16.msrb.mxu1 %v2558_v3 }
 0x218   : > { %936 = vmatpush.bf16.msrb.mxu1 %v2564_v4 }
 0x21c   : > { %937 = vmatpush.bf16.msrb.mxu1 %v2570_v5 }
 0x220   : > { %938 = vmatpush.bf16.msrb.mxu1 %v2576_v6 }
 0x224   : > { %939 = vmatpush.bf16.msrb.mxu1 %v2579_v7 }
 0x228   : > { %940 = vmatpush.bf16.msrb.mxu1 %v2588_v8 }
 0x288   : > { %v628_v58 = vpop.f32.mrf.mxu1 }
 0x289   : > { %v632_v59 = vadd.f32 %v628_v58, %v475_v57 }
 0x28b   : > { %1988 = vtanh.f32 %v632_v59 }
 0x290   : > { %v630_v60 = vpop.f32.mrf.mxu1 }
 0x291   : > { %v1989_v61 = vpop.eup %1988 }
 0x292   : > { %v638_v62 = vpack.c.bf16 %v1989_v61, %v1989_v61  ;;  %v725_v0 = vpack.c.bf16 %v1989_v61, %v1987_v44 }
 0x294   : > { %647 = vmatmul.bf16.vlgmr.msrb.gmra.mxu2 %v638_v62 }
 0x295   : > { %1005 = vmatpush.bf16.msrb.mxu2 %v2546_v1 }
 0x299   : > { %1006 = vmatpush.bf16.msrb.mxu2 %v2552_v2 }
 0x29d   : > { %1007 = vmatpush.bf16.msrb.mxu2 %v2558_v3 }
 0x2a1   : > { %1008 = vmatpush.bf16.msrb.mxu2 %v2564_v4 }
 0x2a4   : > { %802 = vmatmul.bf16.vlgmr.msra.gmra.mxu2 %v724_v63 }
 0x2a5   : > { %1009 = vmatpush.bf16.msrb.mxu2 %v2570_v5 }
 0x2a9   : > { %1010 = vmatpush.bf16.msrb.mxu2 %v2576_v6 }
 0x2ad   : > { %1011 = vmatpush.bf16.msrb.mxu2 %v2579_v7 }
 0x2b1   : > { %1012 = vmatpush.bf16.msrb.mxu2 %v2588_v8 }
 0x2b4   : > { %807 = vmatmul.bf16.gmra.mxu2 %v725_v0 }
 0x2b5   : > { %1238 = vmatpush.bf16.msra.mxu2 %v2643_v15 }
 0x2b9   : > { %1239 = vmatpush.bf16.msra.mxu2 %v2650_v18 }
 0x2bd   : > { %1240 = vmatpush.bf16.msra.mxu2 %v2656_v21 }
 0x317   : > { %v648_v11 = vpop.f32.mrf.mxu2 }
 0x318   : > { %v652_v12 = vadd.f32 %v648_v11, %v478_v10 }
 0x31a   : > { %1990 = vtanh.f32 %v652_v12 }
 0x31f   : > { %v650_v13 = vpop.f32.mrf.mxu2 }
 0x320   : > { %v1991_v14 = vpop.eup %1990 }
 0x321   : > { %v658_v17 = vpack.c.bf16 %v1991_v14, %v1991_v14 }
 0x323   : > { %667 = vmatmul.bf16.vlgmr.msrb.gmra.mxu3 %v658_v17 }
 0x324   : > { %951 = vmatpush.bf16.msrb.mxu3 %v2546_v1 }
 0x327   : > { %v803_v30 = vpop.f32.mrf.mxu2 }
 0x328   : > { %952 = vmatpush.bf16.msrb.mxu3 %v2552_v2  ;;  %v804_v31 = vadd.f32 %v2615_v29, %v803_v30 }
 0x32c   : > { %953 = vmatpush.bf16.msrb.mxu3 %v2558_v3 }
 0x32f   : > { %v805_v45 = vpop.f32.mrf.mxu2 }
 0x330   : > { %954 = vmatpush.bf16.msrb.mxu3 %v2564_v4  ;;  %v806_v46 = vadd.f32 %v2615_v29, %v805_v45 }
 0x333   : > { %905 = vmatmul.bf16.vlgmr.msra.gmra.mxu3 %v2300_v19 }
 0x334   : > { %955 = vmatpush.bf16.msrb.mxu3 %v2570_v5 }
 0x337   : > { %v808_v58 = vpop.f32.mrf.mxu2 }
 0x338   : > { %956 = vmatpush.bf16.msrb.mxu3 %v2576_v6  ;;  %v809_v59 = vadd.f32 %v2615_v29, %v808_v58 }
 0x33c   : > { %957 = vmatpush.bf16.msrb.mxu3 %v2579_v7 }
 0x340   : > { %958 = vmatpush.bf16.msrb.mxu3 %v2588_v8 }
 0x344   : > { %1023 = vmatpush.bf16.msra.mxu3 %v2546_v1 }
 0x348   : > { %1024 = vmatpush.bf16.msra.mxu3 %v2552_v2 }
 0x34c   : > { %1025 = vmatpush.bf16.msra.mxu3 %v2558_v3 }
 0x350   : > { %1026 = vmatpush.bf16.msra.mxu3 %v2564_v4 }
 0x354   : > { %1027 = vmatpush.bf16.msra.mxu3 %v2570_v5 }
 0x358   : > { %1028 = vmatpush.bf16.msra.mxu3 %v2576_v6 }
 0x35c   : > { %1029 = vmatpush.bf16.msra.mxu3 %v2579_v7 }
 0x360   : > { %1030 = vmatpush.bf16.msra.mxu3 %v2588_v8 }
 0x3a6   : > { %v668_v23 = vpop.f32.mrf.mxu3 }
 0x3a7   : > { %v672_v24 = vadd.f32 %v668_v23, %v480_v22  ;;  %v2662_v22 = vld [vmem:[#allocation10 + $0xa0] sm:$0xff]  ;;  %v2668_v23 = vld [vmem:[#allocation10 + $0x98] sm:$0xff] }
 0x3a8   : > { %1241 = vmatpush.bf16.msra.mxu2 %v2662_v22 }
 0x3a9   : > { %1992 = vtanh.f32 %v672_v24  ;;  %v2674_v24 = vld [vmem:[#allocation10 + $0x90] sm:$0xff] }
 0x3ac   : > { %1242 = vmatpush.bf16.msra.mxu2 %v2668_v23 }
 0x3ae   : > { %v670_v25 = vpop.f32.mrf.mxu3 }
 0x3af   : > { %v1993_v26 = vpop.eup %1992  ;;  %v2677_v25 = vld [vmem:[#allocation10 + $0x88] sm:$0xff] }
 0x3b0   : > { %v678_v27 = vpack.c.bf16 %v1993_v26, %v1993_v26  ;;  %v726_v28 = vpack.c.bf16 %v1993_v26, %v1991_v14  ;;  %1243 = vmatpush.bf16.msra.mxu2 %v2674_v24  ;;  %v2686_v26 = vld [vmem:[#allocation10 + $0x80] sm:$0xff] }
 0x3b2   : > { %687 = vmatmul.bf16.vlgmr.msrb.gmra.mxu0 %v678_v27  ;;  %812 = vmatmul.bf16.gmra.mxu2 %v726_v28 }
 0x3b3   : > { %969 = vmatpush.bf16.msrb.mxu0 %v2546_v1 }
 0x3b4   : > { %1244 = vmatpush.bf16.msra.mxu2 %v2677_v25 }
 0x3b6   : > { %v906_v32 = vpop.f32.mrf.mxu3 }
 0x3b7   : > { %v910_v33 = vadd.f32 %v906_v32, %v804_v31  ;;  %970 = vmatpush.bf16.msrb.mxu0 %v2552_v2 }
 0x3b8   : > { %1245 = vmatpush.bf16.msra.mxu2 %v2686_v26 }
 0x3b9   : > { %1994 = vtanh.f32 %v910_v33 }
 0x3bb   : > { %971 = vmatpush.bf16.msrb.mxu0 %v2558_v3 }
 0x3be   : > { %v908_v34 = vpop.f32.mrf.mxu3 }
 0x3bf   : > { %v2621_v35 = vpop.eup %1994  ;;  %972 = vmatpush.bf16.msrb.mxu0 %v2564_v4 }
 0x3c0   : > { %v914_v36 = vpack.c.bf16 %v2621_v35, %v2621_v35 }
 0x3c2   : > { %923 = vmatmul.bf16.vlgmr.msra.gmra.mxu0 %v914_v36 }
 0x3c3   : > { %973 = vmatpush.bf16.msrb.mxu0 %v2570_v5 }
 0x3c7   : > { %974 = vmatpush.bf16.msrb.mxu0 %v2576_v6 }
 0x3cb   : > { %975 = vmatpush.bf16.msrb.mxu0 %v2579_v7 }
 0x3cf   : > { %976 = vmatpush.bf16.msrb.mxu0 %v2588_v8 }
 0x42f   : > { %v688_v40 = vpop.f32.mrf.mxu0 }
 0x430   : > { %v692_v41 = vadd.f32 %v688_v40, %v483_v39 }
 0x432   : > { %1996 = vtanh.f32 %v692_v41 }
 0x437   : > { %v690_v42 = vpop.f32.mrf.mxu0 }
 0x438   : > { %v1997_v43 = vpop.eup %1996  ;;  %v2711_v42 = vld [vmem:[#allocation12 + $0x2] ss:$0 sm:$0xff] }
 0x439   : > { %v698_v44 = vpack.c.bf16 %v1997_v43, %v1997_v43 }
 0x43b   : > { %707 = vmatmul.bf16.vlgmr.msra.gmra.mxu1 %v698_v44 }
 0x43c   : > { %987 = vmatpush.bf16.msra.mxu1 %v2546_v1  ;;  %v1858_v1 = vld [vmem:[#allocation9 + $0x78] sm:$0xff] }
 0x43d   : > { %1118 = vmatpush.bf16.msra.mxu0 %v1858_v1 }
 0x43f   : > { %v924_v47 = vpop.f32.mrf.mxu0 }
 0x440   : > { %v928_v48 = vadd.f32 %v924_v47, %v806_v46  ;;  %988 = vmatpush.bf16.msra.mxu1 %v2552_v2  ;;  %v1856_v2 = vld [vmem:[#allocation9 + $0x68] sm:$0xff] }
 0x441   : > { %1119 = vmatpush.bf16.msra.mxu0 %v1857_v20 }
 0x442   : > { %1998 = vtanh.f32 %v928_v48 }
 0x444   : > { %989 = vmatpush.bf16.msra.mxu1 %v2558_v3  ;;  %v1855_v3 = vld [vmem:[#allocation9 + $0x60] sm:$0xff] }
 0x445   : > { %1120 = vmatpush.bf16.msra.mxu0 %v1856_v2 }
 0x447   : > { %v926_v49 = vpop.f32.mrf.mxu0 }
 0x448   : > { %v1999_v50 = vpop.eup %1998  ;;  %990 = vmatpush.bf16.msra.mxu1 %v2564_v4  ;;  %v1854_v4 = vld [vmem:[#allocation9 + $0x58] sm:$0xff] }
 0x449   : > { %v932_v51 = vpack.c.bf16 %v1999_v50, %v1999_v50  ;;  %1121 = vmatpush.bf16.msra.mxu0 %v1855_v3  ;;  %v1047_v16 = vpack.c.bf16 %v1999_v50, %v2621_v35 }
 0x44b   : > { %941 = vmatmul.bf16.vlgmr.msrb.gmra.mxu1 %v932_v51 }
 0x44c   : > { %991 = vmatpush.bf16.msra.mxu1 %v2570_v5  ;;  %v1853_v5 = vld [vmem:[#allocation9 + $0x50] sm:$0xff] }
 0x44d   : > { %1122 = vmatpush.bf16.msra.mxu0 %v1854_v4 }
 0x450   : > { %992 = vmatpush.bf16.msra.mxu1 %v2576_v6  ;;  %v1852_v6 = vld [vmem:[#allocation9 + $0x48] sm:$0xff] }
 0x451   : > { %1123 = vmatpush.bf16.msra.mxu0 %v1853_v5 }
 0x454   : > { %993 = vmatpush.bf16.msra.mxu1 %v2579_v7  ;;  %v1851_v7 = vld [vmem:[#allocation9 + $0x40] sm:$0xff] }
 0x455   : > { %1124 = vmatpush.bf16.msra.mxu0 %v1852_v6 }
 0x458   : > { %994 = vmatpush.bf16.msra.mxu1 %v2588_v8  ;;  %v810_v8 = vpop.f32.mrf.mxu2 }
 0x459   : > { %1125 = vmatpush.bf16.msra.mxu0 %v1851_v7  ;;  %v811_v9 = vadd.f32 %v2615_v29, %v810_v8 }
 0x45c   : > { %1221 = vmatpush.bf16.msrb.mxu1 %v2643_v15 }
 0x460   : > { %1222 = vmatpush.bf16.msrb.mxu1 %v2650_v18  ;;  %v813_v27 = vpop.f32.mrf.mxu2 }
 0x461   : > { %v814_v28 = vadd.f32 %v2615_v29, %v813_v27 }
 0x464   : > { %1223 = vmatpush.bf16.msrb.mxu1 %v2656_v21 }
 0x468   : > { %1224 = vmatpush.bf16.msrb.mxu1 %v2662_v22 }
 0x46c   : > { %1225 = vmatpush.bf16.msrb.mxu1 %v2668_v23 }
 0x470   : > { %1226 = vmatpush.bf16.msrb.mxu1 %v2674_v24 }
 0x474   : > { %1227 = vmatpush.bf16.msrb.mxu1 %v2677_v25 }
 0x478   : > { %1228 = vmatpush.bf16.msrb.mxu1 %v2686_v26 }
 0x4b8   : > { %v708_v53 = vpop.f32.mrf.mxu1 }
 0x4b9   : > { %v712_v54 = vadd.f32 %v708_v53, %v485_v52 }
 0x4bb   : > { %2000 = vtanh.f32 %v712_v54 }
 0x4c0   : > { %v710_v55 = vpop.f32.mrf.mxu1 }
 0x4c1   : > { %v2001_v56 = vpop.eup %2000 }
 0x4c2   : > { %v727_v57 = vpack.c.bf16 %v2001_v56, %v1997_v43 }
 0x4c4   : > { %817 = vmatmul.bf16.gmra.mxu2 %v727_v57 }
 0x4c8   : > { %v942_v60 = vpop.f32.mrf.mxu1 }
 0x4c9   : > { %v946_v61 = vadd.f32 %v942_v60, %v809_v59 }
 0x4cb   : > { %2002 = vtanh.f32 %v946_v61 }
 0x4d0   : > { %v944_v62 = vpop.f32.mrf.mxu1 }
 0x4d1   : > { %v2003_v63 = vpop.eup %2002 }
 0x4d2   : > { %v950_v0 = vpack.c.bf16 %v2003_v63, %v2003_v63 }
 0x4d4   : > { %959 = vmatmul.bf16.vlgmr.msrb.gmra.mxu3 %v950_v0 }
 0x4d5   : > { %1255 = vmatpush.bf16.msrb.mxu3 %v2643_v15 }
 0x4d9   : > { %1256 = vmatpush.bf16.msrb.mxu3 %v2650_v18 }
 0x4dd   : > { %1257 = vmatpush.bf16.msrb.mxu3 %v2656_v21 }
 0x4e1   : > { %1258 = vmatpush.bf16.msrb.mxu3 %v2662_v22 }
 0x4e5   : > { %1259 = vmatpush.bf16.msrb.mxu3 %v2668_v23 }
 0x4e9   : > { %1260 = vmatpush.bf16.msrb.mxu3 %v2674_v24 }
 0x4ed   : > { %1261 = vmatpush.bf16.msrb.mxu3 %v2677_v25 }
 0x4f1   : > { %1262 = vmatpush.bf16.msrb.mxu3 %v2686_v26 }
 0x557   : > { %v960_v10 = vpop.f32.mrf.mxu3 }
 0x558   : > { %v964_v11 = vadd.f32 %v960_v10, %v811_v9 }
 0x55a   : > { %2004 = vtanh.f32 %v964_v11 }
 0x55f   : > { %v962_v12 = vpop.f32.mrf.mxu3 }
 0x560   : > { %v2005_v13 = vpop.eup %2004 }
 0x561   : > { %v968_v14 = vpack.c.bf16 %v2005_v13, %v2005_v13  ;;  %v1048_v17 = vpack.c.bf16 %v2005_v13, %v2003_v63 }
 0x563   : > { %977 = vmatmul.bf16.vlgmr.msrb.gmra.mxu0 %v968_v14 }
 0x564   : > { %1323 = vmatpush.bf16.msrb.mxu0 %v2643_v15 }
 0x568   : > { %1324 = vmatpush.bf16.msrb.mxu0 %v2650_v18 }
 0x56c   : > { %1325 = vmatpush.bf16.msrb.mxu0 %v2656_v21 }
 0x570   : > { %1326 = vmatpush.bf16.msrb.mxu0 %v2662_v22 }
 0x573   : > { %1126 = vmatmul.bf16.vlgmr.msra.gmra.mxu0 %v1047_v16 }
 0x574   : > { %1327 = vmatpush.bf16.msrb.mxu0 %v2668_v23 }
 0x578   : > { %1328 = vmatpush.bf16.msrb.mxu0 %v2674_v24 }
 0x57c   : > { %1329 = vmatpush.bf16.msrb.mxu0 %v2677_v25 }
 0x580   : > { %1330 = vmatpush.bf16.msrb.mxu0 %v2686_v26 }
 0x583   : > { %1131 = vmatmul.bf16.gmra.mxu0 %v1048_v17 }
 0x5e0   : > { %v978_v30 = vpop.f32.mrf.mxu0 }
 0x5e1   : > { %v982_v31 = vadd.f32 %v978_v30, %v814_v28 }
 0x5e3   : > { %2006 = vtanh.f32 %v982_v31 }
 0x5e8   : > { %v980_v32 = vpop.f32.mrf.mxu0 }
 0x5e9   : > { %v2007_v33 = vpop.eup %2006 }
 0x5ea   : > { %v986_v34 = vpack.c.bf16 %v2007_v33, %v2007_v33 }
 0x5ec   : > { %995 = vmatmul.bf16.vlgmr.msra.gmra.mxu1 %v986_v34 }
 0x5ed   : > { %1272 = vmatpush.bf16.msra.mxu1 %v2643_v15 }
 0x5f0   : > { %v1127_v43 = vpop.f32.mrf.mxu0 }
 0x5f1   : > { %1273 = vmatpush.bf16.msra.mxu1 %v2650_v18  ;;  %v1128_v44 = vadd.f32 %v2711_v42, %v1127_v43 }
 0x5f5   : > { %1274 = vmatpush.bf16.msra.mxu1 %v2656_v21 }
 0x5f8   : > { %v1129_v58 = vpop.f32.mrf.mxu0 }
 0x5f9   : > { %1275 = vmatpush.bf16.msra.mxu1 %v2662_v22  ;;  %v1130_v59 = vadd.f32 %v2711_v42, %v1129_v58  ;;  %v1981_v58 = vld [vmem:[%s2781_s6] ss:$0 sm:$0xff] }
 0x5fc   : > { %1229 = vmatmul.bf16.vlgmr.msrb.gmra.mxu1 %v2300_v19  ;;  %v815_v19 = vpop.f32.mrf.mxu2 }
 0x5fd   : > { %1276 = vmatpush.bf16.msra.mxu1 %v2668_v23  ;;  %v816_v35 = vadd.f32 %v2615_v29, %v815_v19 }
 0x600   : > { %v1132_v6 = vpop.f32.mrf.mxu0 }
 0x601   : > { %1277 = vmatpush.bf16.msra.mxu1 %v2674_v24  ;;  %v1133_v7 = vadd.f32 %v2711_v42, %v1132_v6 }
 0x604   : > { %v818_v50 = vpop.f32.mrf.mxu2 }
 0x605   : > { %1278 = vmatpush.bf16.msra.mxu1 %v2677_v25  ;;  %v819_v52 = vadd.f32 %v2615_v29, %v818_v50  ;;  %v1868_v50 = vld [vmem:[#allocation13 + $0x8] sm:$0xff] }
 0x608   : > { %v1134_v13 = vpop.f32.mrf.mxu0 }
 0x609   : > { %1279 = vmatpush.bf16.msra.mxu1 %v2686_v26 }
 0x60c   : > { %v820_v51 = vpop.f32.mrf.mxu2 }
 0x60d   : > { %1340 = vmatpush.bf16.msrb.mxu1 %v2643_v15  ;;  %v821_v1 = vadd.f32 %v2615_v29, %v820_v51  ;;  %v1135_v29 = vadd.f32 %v2711_v42, %v1134_v13  ;;  %v1867_v51 = vld [vmem:[#allocation13] sm:$0xff] }
 0x611   : > { %1341 = vmatpush.bf16.msrb.mxu1 %v2650_v18 }
 0x615   : > { %1342 = vmatpush.bf16.msrb.mxu1 %v2656_v21 }
 0x619   : > { %1343 = vmatpush.bf16.msrb.mxu1 %v2662_v22 }
 0x61d   : > { %1344 = vmatpush.bf16.msrb.mxu1 %v2668_v23 }
 0x621   : > { %1345 = vmatpush.bf16.msrb.mxu1 %v2674_v24 }
 0x625   : > { %1346 = vmatpush.bf16.msrb.mxu1 %v2677_v25 }
 0x629   : > { %1347 = vmatpush.bf16.msrb.mxu1 %v2686_v26 }
 0x669   : > { %v996_v36 = vpop.f32.mrf.mxu1 }
 0x66a   : > { %v1000_v37 = vadd.f32 %v996_v36, %v816_v35  ;;  %v1874_v35 = vld [vmem:[#allocation13 + $0x38] sm:$0xff] }
 0x66c   : > { %2008 = vtanh.f32 %v1000_v37  ;;  %v1873_v37 = vld [vmem:[#allocation13 + $0x30] sm:$0xff] }
 0x671   : > { %v998_v38 = vpop.f32.mrf.mxu1 }
 0x672   : > { %v2009_v39 = vpop.eup %2008  ;;  %v1872_v38 = vld [vmem:[#allocation13 + $0x28] sm:$0xff] }
 0x673   : > { %v1004_v40 = vpack.c.bf16 %v2009_v39, %v2009_v39  ;;  %v1049_v41 = vpack.c.bf16 %v2009_v39, %v2007_v33  ;;  %v1871_v39 = vld [vmem:[#allocation13 + $0x20] sm:$0xff] }
 0x675   : > { %1013 = vmatmul.bf16.vlgmr.msrb.gmra.mxu2 %v1004_v40  ;;  %1136 = vmatmul.bf16.gmra.mxu0 %v1049_v41  ;;  %v1870_v41 = vld [vmem:[#allocation13 + $0x18] sm:$0xff] }
 0x676   : > { %1289 = vmatpush.bf16.msrb.mxu2 %v2643_v15 }
 0x679   : > { %v1230_v45 = vpop.f32.mrf.mxu1 }
 0x67a   : > { %v1234_v46 = vadd.f32 %v1230_v45, %v1128_v44  ;;  %1290 = vmatpush.bf16.msrb.mxu2 %v2650_v18 }
 0x67c   : > { %2010 = vtanh.f32 %v1234_v46 }
 0x67e   : > { %1291 = vmatpush.bf16.msrb.mxu2 %v2656_v21 }
 0x681   : > { %v1232_v47 = vpop.f32.mrf.mxu1 }
 0x682   : > { %v2011_v48 = vpop.eup %2010  ;;  %1292 = vmatpush.bf16.msrb.mxu2 %v2662_v22 }
 0x683   : > { %v1237_v49 = vpack.c.bf16 %v2011_v48, %v2011_v48 }
 0x685   : > { %1246 = vmatmul.bf16.vlgmr.msra.gmra.mxu2 %v1237_v49  ;;  %v1869_v49 = vld [vmem:[#allocation13 + $0x10] sm:$0xff] }
 0x686   : > { %1293 = vmatpush.bf16.msrb.mxu2 %v2668_v23 }
 0x68a   : > { %1294 = vmatpush.bf16.msrb.mxu2 %v2674_v24 }
 0x68e   : > { %1295 = vmatpush.bf16.msrb.mxu2 %v2677_v25 }
 0x692   : > { %1296 = vmatpush.bf16.msrb.mxu2 %v2686_v26 }
 0x696   : > { %1424 = vmatpush.bf16.msra.mxu2 %v1874_v35 }
 0x69a   : > { %1425 = vmatpush.bf16.msra.mxu2 %v1873_v37 }
 0x69e   : > { %1426 = vmatpush.bf16.msra.mxu2 %v1872_v38 }
 0x6a2   : > { %1427 = vmatpush.bf16.msra.mxu2 %v1871_v39 }
 0x6a6   : > { %1428 = vmatpush.bf16.msra.mxu2 %v1870_v41 }
 0x6aa   : > { %1429 = vmatpush.bf16.msra.mxu2 %v1869_v49 }
 0x6ae   : > { %1430 = vmatpush.bf16.msra.mxu2 %v1868_v50 }
 0x6b2   : > { %1431 = vmatpush.bf16.msra.mxu2 %v1867_v51 }
 0x6f8   : > { %v1014_v53 = vpop.f32.mrf.mxu2 }
 0x6f9   : > { %v1018_v54 = vadd.f32 %v1014_v53, %v819_v52 }
 0x6fb   : > { %2012 = vtanh.f32 %v1018_v54 }
 0x700   : > { %v1016_v55 = vpop.f32.mrf.mxu2 }
 0x701   : > { %v2013_v56 = vpop.eup %2012 }
 0x702   : > { %v1022_v57 = vpack.c.bf16 %v2013_v56, %v2013_v56 }
 0x704   : > { %1031 = vmatmul.bf16.vlgmr.msra.gmra.mxu3 %v1022_v57 }
 0x705   : > { %1306 = vmatpush.bf16.msra.mxu3 %v2643_v15 }
 0x708   : > { %v1247_v60 = vpop.f32.mrf.mxu2 }
 0x709   : > { %v1251_v61 = vadd.f32 %v1247_v60, %v1130_v59  ;;  %1307 = vmatpush.bf16.msra.mxu3 %v2650_v18 }
 0x70b   : > { %2014 = vtanh.f32 %v1251_v61 }
 0x70d   : > { %1308 = vmatpush.bf16.msra.mxu3 %v2656_v21  ;;  %v1137_v21 = vpop.f32.mrf.mxu0 }
 0x710   : > { %v1249_v62 = vpop.f32.mrf.mxu2 }
 0x711   : > { %v2015_v63 = vpop.eup %2014  ;;  %1309 = vmatpush.bf16.msra.mxu3 %v2662_v22  ;;  %v1138_v22 = vadd.f32 %v2711_v42, %v1137_v21 }
 0x712   : > { %v1254_v0 = vpack.c.bf16 %v2015_v63, %v2015_v63 }
 0x714   : > { %1263 = vmatmul.bf16.vlgmr.msrb.gmra.mxu3 %v1254_v0 }
 0x715   : > { %1310 = vmatpush.bf16.msra.mxu3 %v2668_v23  ;;  %v1139_v28 = vpop.f32.mrf.mxu0 }
 0x716   : > { %v1140_v30 = vadd.f32 %v2711_v42, %v1139_v28 }
 0x719   : > { %1311 = vmatpush.bf16.msra.mxu3 %v2674_v24 }
 0x71d   : > { %1312 = vmatpush.bf16.msra.mxu3 %v2677_v25 }
 0x721   : > { %1313 = vmatpush.bf16.msra.mxu3 %v2686_v26 }
 0x787   : > { %v1032_v20 = vpop.f32.mrf.mxu3 }
 0x788   : > { %v1036_v2 = vadd.f32 %v1032_v20, %v821_v1 }
 0x78a   : > { %2016 = vtanh.f32 %v1036_v2 }
 0x78f   : > { %v1034_v3 = vpop.f32.mrf.mxu3 }
 0x790   : > { %v2017_v4 = vpop.eup %2016 }
 0x791   : > { %v1050_v5 = vpack.c.bf16 %v2017_v4, %v2013_v56 }
 0x793   : > { %1141 = vmatmul.bf16.gmra.mxu0 %v1050_v5 }
 0x797   : > { %v1264_v8 = vpop.f32.mrf.mxu3 }
 0x798   : > { %v1268_v9 = vadd.f32 %v1264_v8, %v1133_v7 }
 0x79a   : > { %2018 = vtanh.f32 %v1268_v9 }
 0x79f   : > { %v1266_v10 = vpop.f32.mrf.mxu3 }
 0x7a0   : > { %v2019_v11 = vpop.eup %2018 }
 0x7a1   : > { %v1271_v12 = vpack.c.bf16 %v2019_v11, %v2019_v11 }
 0x7a3   : > { %1280 = vmatmul.bf16.vlgmr.msra.gmra.mxu1 %v1271_v12 }
 0x810   : > { %v1142_v36 = vpop.f32.mrf.mxu0 }
 0x811   : > { %v1143_v43 = vadd.f32 %v2711_v42, %v1142_v36 }
 0x818   : > { %v1144_v40 = vpop.f32.mrf.mxu0 }
 0x819   : > { %v1145_v52 = vadd.f32 %v2711_v42, %v1144_v40 }
 0x820   : > { %v1281_v14 = vpop.f32.mrf.mxu1 }
 0x821   : > { %v1285_v15 = vadd.f32 %v1281_v14, %v1135_v29 }
 0x823   : > { %2020 = vtanh.f32 %v1285_v15 }
 0x828   : > { %v1283_v16 = vpop.f32.mrf.mxu1 }
 0x829   : > { %v2021_v17 = vpop.eup %2020 }
 0x82a   : > { %v1288_v18 = vpack.c.bf16 %v2021_v17, %v2021_v17 }
 0x82c   : > { %1297 = vmatmul.bf16.vlgmr.msrb.gmra.mxu2 %v1288_v18 }
 0x8af   : > { %v1298_v23 = vpop.f32.mrf.mxu2 }
 0x8b0   : > { %v1302_v24 = vadd.f32 %v1298_v23, %v1138_v22 }
 0x8b2   : > { %2022 = vtanh.f32 %v1302_v24 }
 0x8b7   : > { %v1300_v25 = vpop.f32.mrf.mxu2 }
 0x8b8   : > { %v2023_v26 = vpop.eup %2022 }
 0x8b9   : > { %v1305_v27 = vpack.c.bf16 %v2023_v26, %v2023_v26 }
 0x8bb   : > { %1314 = vmatmul.bf16.vlgmr.msra.gmra.mxu3 %v1305_v27 }
 0x93e   : > { %v1315_v31 = vpop.f32.mrf.mxu3 }
 0x93f   : > { %v1319_v32 = vadd.f32 %v1315_v31, %v1140_v30 }
 0x941   : > { %2024 = vtanh.f32 %v1319_v32 }
 0x946   : > { %v1317_v33 = vpop.f32.mrf.mxu3 }
 0x947   : > { %v2025_v34 = vpop.eup %2024 }
 0x948   : > { %v1322_v19 = vpack.c.bf16 %v2025_v34, %v2025_v34 }
 0x94a   : > { %1331 = vmatmul.bf16.vlgmr.msrb.gmra.mxu0 %v1322_v19 }
 0x9c7   : > { %v1332_v44 = vpop.f32.mrf.mxu0 }
 0x9c8   : > { %v1336_v45 = vadd.f32 %v1332_v44, %v1143_v43 }
 0x9ca   : > { %2026 = vtanh.f32 %v1336_v45 }
 0x9cf   : > { %v1334_v46 = vpop.f32.mrf.mxu0 }
 0x9d0   : > { %v2027_v47 = vpop.eup %2026 }
 0x9d1   : > { %v1339_v48 = vpack.c.bf16 %v2027_v47, %v2027_v47 }
 0x9d3   : > { %1348 = vmatmul.bf16.vlgmr.msrb.gmra.mxu1 %v1339_v48 }
 0xa50   : > { %v1349_v53 = vpop.f32.mrf.mxu1 }
 0xa51   : > { %v1353_v54 = vadd.f32 %v1349_v53, %v1145_v52 }
 0xa53   : > { %2028 = vtanh.f32 %v1353_v54 }
 0xa58   : > { %v1351_v55 = vpop.f32.mrf.mxu1 }
 0xa59   : > { %v2029_v56 = vpop.eup %2028 }
 0xa5a   : > { %v1355_v57 = vpack.c.bf16 %v2029_v56, %v2029_v56 }
 0xa5c   : > { %1432 = vmatmul.bf16.vlgmr.msra.gmra.mxu2 %v1355_v57 }
 0xadf   : > { %v1433_v42 = vpop.f32.mrf.mxu2 }
 0xae0   : > { %v1434_v59 = vadd.f32 %v1981_v58, %v1433_v42 }
 0xae2   : > { %v1437_v60 = vmax.f32 %v1434_v59, 0.0 }
 0xae4   : > { %1438 = vst [vmem:[%s378_s21] sm:$0xff] %v1437_v60 }
 0xae5   : > { %2237 = shalt.err (!%p2234_p10)
}
 0xae6   : > { %1897 = dma.vmem_to_hbm [thread:$0]  (%p2433_p5), %s1453_s19, 128, %s1455_s20, %s1440_s14  }
 0xae7   : > { %v1435_v61 = vpop.f32.mrf.mxu2 }
 0xae8 PF: > { %p1934_p11 = scmp.ge.s32.totalorder %s2288_s27, 2  ;;  %s1466_s18 = sand.u32 1, %s2276_s24  }
 0xae9   : > { %s1467_s12 = scalar_lea.sflag [#allocation6], %s1466_s18 }
 0xaea   : > { %p1920_p12 = pnand %p1934_p11, %p2376_p6 }
 0xaec   : > { %p1921_p13 = pneg %p1920_p12 }
 0xaee   : > { %2271 = dma.done.wait (%p1921_p13), %s1467_s12, 128  }
 0xaef   : > { %2273 = vsyncadd (%p1921_p13), %s1467_s12, 4294967168  ;;  %p23_p0 = scmp.ge.s32.totalorder %s2417_s9, 6   ;;  %s2793_s24 = smov %s2280_s25 }
 0xaf0   : > { %s2794_s25 = smov %s2284_s26  ;;  %s2795_s26 = smov %s2429_s11 }
 0xaf1   : > { %s2796_s27 = smov %s2417_s9  ;;  %25 = sbr.rel (!%p23_p0) target bundleno = 11 (0xb), region = 130 }
 0xaf6   :  { %1473 = vsyncpa [#allocation5], 1 }
 0xaf7   :  { %1475 = vsyncpa [#allocation5 + $0x1], 1 }
 0xaf8   :  { %1476 = vsyncpa [#allocation8], 1 }
 0xaf9   :  { %1477 = vsyncpa [#allocation11], 1 }
 0xafa   :  { %1478 = vsyncpa [#allocation14], 1 }
 0xafb   :  { %1479 = vsyncpa [#allocation6], 1 }
 0xafc   :  { %1481 = vsyncpa [#allocation6 + $0x1], 1 }

</bundles_post_ra>
